<compile_context>
chip_gen: v7x
topology: tpu7x:2x2x1
jax: 0.10.0
libtpu: 0.0.40
codegen_flags: <defaults>
</compile_context>

<pallas_src>
import math
import functools

import jax
import jax.numpy as jnp
import numpy as np
from jax.experimental import pallas as pl
from jax.experimental.pallas import tpu as pltpu


# ----------------------------------------------------------------------------
# Fused MHA kernel: one invocation processes the whole (flattened) batch.
# ----------------------------------------------------------------------------
def _mha_fused_kernel(xq_ref, xk_ref, xv_ref,
                      wq_ref, bq_ref,
                      wk_ref, bk_ref,
                      wv_ref, bv_ref,
                      wo_ref, bo_ref,
                      o_ref, ctx_ref,
                      *, batch, num_head, scale, compute_dtype):
    cdt = compute_dtype

    # --- fused Q/K/V projections: compute-dtype MXU feeds, f32 accumulation ---
    q = jnp.dot(xq_ref[...], wq_ref[...],
                preferred_element_type=jnp.float32) + bq_ref[...]     # (B*nq, hsize)
    k = jnp.dot(xk_ref[...], wk_ref[...],
                preferred_element_type=jnp.float32) + bk_ref[...]     # (B*seql, hsize)
    v = (jnp.dot(xv_ref[...], wv_ref[...],
                 preferred_element_type=jnp.float32) + bv_ref[...]).astype(cdt)

    # Scale folded into Q once (== scaling the scores; bias scaled consistently).
    q = (q * scale).astype(cdt)
    # K transposed ONCE: per-(batch, head) tiles below are sublane-aligned views
    # and the score dot is a natural (M,K)x(K,N) contraction (no per-head vxpose).
    kT = jnp.transpose(k).astype(cdt)                                 # (hsize, B*seql)

    mq, hsize = q.shape
    nq = mq // batch
    seql = kT.shape[1] // batch
    adim = hsize // num_head

    # --- attention per (batch, head); contexts assembled into a lane-dense
    #     (B*nq, hsize) f32 VMEM scratch so the output projection is ONE matmul ---
    # TODO(synk): at production nq/seql replace this static unroll with a grid
    #             axis / online softmax to bound live ranges and VMEM.
    for b in range(batch):
        rq = slice(b * nq, (b + 1) * nq)
        rk = slice(b * seql, (b + 1) * seql)
        for h in range(num_head):
            hd = slice(h * adim, (h + 1) * adim)
            s = jnp.dot(q[rq, hd], kT[hd, rk],
                        preferred_element_type=jnp.float32)           # (nq, seql)
            # numerically-stable softmax (matches nn.Softmax(dim=-1)), exact division
            s = s - jnp.max(s, axis=-1, keepdims=True)
            p = jnp.exp(s)
            p = p / jnp.sum(p, axis=-1, keepdims=True)
            ctx_ref[rq, hd] = jnp.dot(p.astype(cdt), v[rk, hd],
                                      preferred_element_type=jnp.float32)

    # --- single K=hsize output projection ---
    out = jnp.dot(ctx_ref[...].astype(cdt), wo_ref[...],
                  preferred_element_type=jnp.float32) + bo_ref[...]
    o_ref[...] = out.astype(o_ref.dtype)


def _full_spec(shape):
    """Full-array block; grid has a single step so the block index is constant."""
    return pl.BlockSpec(shape, lambda i, _n=len(shape): (0,) * _n)


def multi_head_attn_forward(iQ, iK, iV, params, num_head,
                            compute_dtype=jnp.bfloat16):
    """Reproduces MultiHeadAttn.forward with mask=None, states=None, dropout=0."""
    B, nq, isize = iQ.shape
    _, seql, k_isize = iK.shape
    v_isize = iV.shape[2]
    hsize = params["wq"].shape[1]
    osize = params["wo"].shape[1]
    adim = hsize // num_head
    scale = 1.0 / math.sqrt(adim)

    # Flatten batch into rows: lane-dense projections with M = B*nq / B*seql.
    xq = iQ.reshape(B * nq, isize).astype(compute_dtype)
    xk = iK.reshape(B * seql, k_isize).astype(compute_dtype)
    xv = iV.reshape(B * seql, v_isize).astype(compute_dtype)

    wq = params["wq"].astype(compute_dtype)
    wk = params["wk"].astype(compute_dtype)
    wv = params["wv"].astype(compute_dtype)
    wo = params["wo"].astype(compute_dtype)
    bq = params["bq"].reshape(1, hsize).astype(jnp.float32)
    bk = params["bk"].reshape(1, hsize).astype(jnp.float32)
    bv = params["bv"].reshape(1, hsize).astype(jnp.float32)
    bo = params["bo"].reshape(1, osize).astype(jnp.float32)

    kernel = functools.partial(_mha_fused_kernel, batch=B, num_head=num_head,
                               scale=scale, compute_dtype=compute_dtype)

    grid_spec = pltpu.PrefetchScalarGridSpec(
        num_scalar_prefetch=0,
        grid=(1,),                                  # single step (review item)
        in_specs=[
            _full_spec((B * nq, isize)),
            _full_spec((B * seql, k_isize)),
            _full_spec((B * seql, v_isize)),
            _full_spec((isize, hsize)), _full_spec((1, hsize)),
            _full_spec((k_isize, hsize)), _full_spec((1, hsize)),
            _full_spec((v_isize, hsize)), _full_spec((1, hsize)),
            _full_spec((hsize, osize)), _full_spec((1, osize)),
        ],
        out_specs=_full_spec((B * nq, osize)),
        scratch_shapes=[pltpu.VMEM((B * nq, hsize), jnp.float32)],
    )

    out = pl.pallas_call(
        kernel,
        out_shape=jax.ShapeDtypeStruct((B * nq, osize), iQ.dtype),
        grid_spec=grid_spec,
        compiler_params=pltpu.CompilerParams(
            dimension_semantics=("arbitrary",)),
    )(xq, xk, xv, wq, bq, wk, bk, wv, bv, wo, bo)

    return out.reshape(B, nq, osize)


# ----------------------------------------------------------------------------
# Params + pure-JAX reference
# ----------------------------------------------------------------------------
def init_params(key, isize, hsize, osize):
    """Deterministic nn.Linear-style init: U(-1/sqrt(fan_in), 1/sqrt(fan_in))."""
    keys = jax.random.split(key, 8)

    def lin(kw, kb, fan_in, fan_out):
        bound = 1.0 / math.sqrt(fan_in)
        w = jax.random.uniform(kw, (fan_in, fan_out), jnp.float32, -bound, bound)
        b = jax.random.uniform(kb, (fan_out,), jnp.float32, -bound, bound)
        return w, b

    wq, bq = lin(keys[0], keys[1], isize, hsize)
    wk, bk = lin(keys[2], keys[3], isize, hsize)
    wv, bv = lin(keys[4], keys[5], isize, hsize)
    wo, bo = lin(keys[6], keys[7], hsize, osize)
    return dict(wq=wq, bq=bq, wk=wk, bk=bk, wv=wv, bv=bv, wo=wo, bo=bo)


def reference_forward(iQ, iK, iV, params, num_head):
    """Pure-JAX f32 reference matching the PyTorch forward semantics."""
    B, nq, _ = iQ.shape
    seql = iK.shape[1]
    hsize = params["wq"].shape[1]
    adim = hsize // num_head
    H = num_head

    q = (iQ @ params["wq"] + params["bq"]).reshape(B, nq, H, adim).transpose(0, 2, 1, 3)
    k = (iK @ params["wk"] + params["bk"]).reshape(B, seql, H, adim).transpose(0, 2, 3, 1)
    v = (iV @ params["wv"] + params["bv"]).reshape(B, seql, H, adim).transpose(0, 2, 1, 3)

    scores = jnp.einsum("bhqd,bhds->bhqs", q, k) / math.sqrt(adim)
    scores = jax.nn.softmax(scores, axis=-1)
    ctx = jnp.einsum("bhqs,bhsd->bhqd", scores, v)
    ctx = ctx.transpose(0, 2, 1, 3).reshape(B, nq, hsize)
    return ctx @ params["wo"] + params["bo"]


# ----------------------------------------------------------------------------
if __name__ == "__main__":
    # Small shapes consistent with the module: batch=2, seq=8, isize=32,
    # hsize=64 (num_head=8 -> adim=8), osize=32.
    B, SEQ, ISIZE, HSIZE, OSIZE, NHEAD = 2, 8, 32, 64, 32, 8

    key = jax.random.PRNGKey(0)
    kq, kk, kv, kp = jax.random.split(key, 4)
    iQ = jax.random.normal(kq, (B, SEQ, ISIZE), jnp.float32)
    iK = jax.random.normal(kk, (B, SEQ, ISIZE), jnp.float32)
    iV = jax.random.normal(kv, (B, SEQ, ISIZE), jnp.float32)

    params = init_params(kp, ISIZE, HSIZE, OSIZE)
    ref = reference_forward(iQ, iK, iV, params, NHEAD)

    # Exactness of the fused math: f32 feeds match the f32 reference tightly
    # (the approx reciprocal that previously forced a 5e-3 tolerance is gone).
    out_f32 = jax.block_until_ready(
        multi_head_attn_forward(iQ, iK, iV, params, NHEAD,
                                compute_dtype=jnp.float32))
    np.testing.assert_allclose(np.asarray(out_f32), np.asarray(ref),
                               rtol=1e-4, atol=1e-5)

    # Performance path: bf16 MXU feeds with f32 accumulation (review item);
    # tolerance reflects bf16 operand rounding only.
    out = jax.block_until_ready(
        multi_head_attn_forward(iQ, iK, iV, params, NHEAD))
    np.testing.assert_allclose(np.asarray(out), np.asarray(ref),
                               rtol=2e-2, atol=2e-2)

    print("KERNEL_OK")
</pallas_src>

<mosaic_0001>
module attributes {stable_mosaic.version = 11 : i64} {
  func.func @_mha_fused_kernel(%arg0: i32, %arg1: memref<16x32xf32, #tpu.memory_space<vmem>>, %arg2: memref<16x32xf32, #tpu.memory_space<vmem>>, %arg3: memref<16x32xf32, #tpu.memory_space<vmem>>, %arg4: memref<32x64xf32, #tpu.memory_space<vmem>>, %arg5: memref<1x64xf32, #tpu.memory_space<vmem>>, %arg6: memref<32x64xf32, #tpu.memory_space<vmem>>, %arg7: memref<1x64xf32, #tpu.memory_space<vmem>>, %arg8: memref<32x64xf32, #tpu.memory_space<vmem>>, %arg9: memref<1x64xf32, #tpu.memory_space<vmem>>, %arg10: memref<64x32xf32, #tpu.memory_space<vmem>>, %arg11: memref<1x32xf32, #tpu.memory_space<vmem>>, %arg12: memref<16x32xf32, #tpu.memory_space<vmem>>, %arg13: memref<16x64xf32, #tpu.memory_space<vmem>>) attributes {dimension_semantics = [#tpu.dimension_semantics<arbitrary>], iteration_bounds = array<i64: 1>, scalar_prefetch = 0 : i64, scratch_operands = 1 : i64, tpu.core_type = #tpu.core_type<tc>, window_params = [{pipeline_mode = #tpu.pipeline_mode<synchronous>, transform_indices = @transform_0, window_bounds = array<i64: 16, 32>}, {pipeline_mode = #tpu.pipeline_mode<synchronous>, transform_indices = @transform_1, window_bounds = array<i64: 16, 32>}, {pipeline_mode = #tpu.pipeline_mode<synchronous>, transform_indices = @transform_2, window_bounds = array<i64: 16, 32>}, {pipeline_mode = #tpu.pipeline_mode<synchronous>, transform_indices = @transform_3, window_bounds = array<i64: 32, 64>}, {pipeline_mode = #tpu.pipeline_mode<synchronous>, transform_indices = @transform_4, window_bounds = array<i64: 1, 64>}, {pipeline_mode = #tpu.pipeline_mode<synchronous>, transform_indices = @transform_5, window_bounds = array<i64: 32, 64>}, {pipeline_mode = #tpu.pipeline_mode<synchronous>, transform_indices = @transform_6, window_bounds = array<i64: 1, 64>}, {pipeline_mode = #tpu.pipeline_mode<synchronous>, transform_indices = @transform_7, window_bounds = array<i64: 32, 64>}, {pipeline_mode = #tpu.pipeline_mode<synchronous>, transform_indices = @transform_8, window_bounds = array<i64: 1, 64>}, {pipeline_mode = #tpu.pipeline_mode<synchronous>, transform_indices = @transform_9, window_bounds = array<i64: 64, 32>}, {pipeline_mode = #tpu.pipeline_mode<synchronous>, transform_indices = @transform_10, window_bounds = array<i64: 1, 32>}, {pipeline_mode = #tpu.pipeline_mode<synchronous>, transform_indices = @transform_11, window_bounds = array<i64: 16, 32>}]} {
    %c0 = arith.constant 0 : index
    %c0_0 = arith.constant 0 : index
    %0 = vector.load %arg1[%c0, %c0_0] : memref<16x32xf32, #tpu.memory_space<vmem>>, vector<16x32xf32>
    %c0_1 = arith.constant 0 : index
    %c0_2 = arith.constant 0 : index
    %1 = vector.load %arg4[%c0_1, %c0_2] : memref<32x64xf32, #tpu.memory_space<vmem>>, vector<32x64xf32>
    %cst = arith.constant dense<0.000000e+00> : vector<16x64xf32>
    %2 = tpu.matmul %0, %1, %cst {dimension_numbers = #tpu.dot_dimension_numbers<[1], [0], [0], [1], [0, 0, 1, 1], [], []>} : vector<16x32xf32>, vector<32x64xf32>, vector<16x64xf32> -> vector<16x64xf32>
    %c0_3 = arith.constant 0 : index
    %c0_4 = arith.constant 0 : index
    %3 = vector.load %arg5[%c0_3, %c0_4] : memref<1x64xf32, #tpu.memory_space<vmem>>, vector<1x64xf32>
    %4 = vector.broadcast %3 : vector<1x64xf32> to vector<16x64xf32>
    %5 = arith.addf %2, %4 : vector<16x64xf32>
    %c0_5 = arith.constant 0 : index
    %c0_6 = arith.constant 0 : index
    %6 = vector.load %arg2[%c0_5, %c0_6] : memref<16x32xf32, #tpu.memory_space<vmem>>, vector<16x32xf32>
    %c0_7 = arith.constant 0 : index
    %c0_8 = arith.constant 0 : index
    %7 = vector.load %arg6[%c0_7, %c0_8] : memref<32x64xf32, #tpu.memory_space<vmem>>, vector<32x64xf32>
    %cst_9 = arith.constant dense<0.000000e+00> : vector<16x64xf32>
    %8 = tpu.matmul %6, %7, %cst_9 {dimension_numbers = #tpu.dot_dimension_numbers<[1], [0], [0], [1], [0, 0, 1, 1], [], []>} : vector<16x32xf32>, vector<32x64xf32>, vector<16x64xf32> -> vector<16x64xf32>
    %c0_10 = arith.constant 0 : index
    %c0_11 = arith.constant 0 : index
    %9 = vector.load %arg7[%c0_10, %c0_11] : memref<1x64xf32, #tpu.memory_space<vmem>>, vector<1x64xf32>
    %10 = vector.broadcast %9 : vector<1x64xf32> to vector<16x64xf32>
    %11 = arith.addf %8, %10 : vector<16x64xf32>
    %c0_12 = arith.constant 0 : index
    %c0_13 = arith.constant 0 : index
    %12 = vector.load %arg3[%c0_12, %c0_13] : memref<16x32xf32, #tpu.memory_space<vmem>>, vector<16x32xf32>
    %c0_14 = arith.constant 0 : index
    %c0_15 = arith.constant 0 : index
    %13 = vector.load %arg8[%c0_14, %c0_15] : memref<32x64xf32, #tpu.memory_space<vmem>>, vector<32x64xf32>
    %cst_16 = arith.constant dense<0.000000e+00> : vector<16x64xf32>
    %14 = tpu.matmul %12, %13, %cst_16 {dimension_numbers = #tpu.dot_dimension_numbers<[1], [0], [0], [1], [0, 0, 1, 1], [], []>} : vector<16x32xf32>, vector<32x64xf32>, vector<16x64xf32> -> vector<16x64xf32>
    %c0_17 = arith.constant 0 : index
    %c0_18 = arith.constant 0 : index
    %15 = vector.load %arg9[%c0_17, %c0_18] : memref<1x64xf32, #tpu.memory_space<vmem>>, vector<1x64xf32>
    %16 = vector.broadcast %15 : vector<1x64xf32> to vector<16x64xf32>
    %17 = arith.addf %14, %16 : vector<16x64xf32>
    %cst_19 = arith.constant 0.353553385 : f32
    %18 = vector.broadcast %cst_19 : f32 to vector<16x64xf32>
    %19 = arith.mulf %5, %18 : vector<16x64xf32>
    %20 = tpu.transpose %11, [1, 0] : vector<16x64xf32> -> vector<64x16xf32>
    %21 = vector.extract_strided_slice %19 {offsets = [0, 0], sizes = [8, 8], strides = [1, 1]} : vector<16x64xf32> to vector<8x8xf32>
    %22 = vector.extract_strided_slice %20 {offsets = [0, 0], sizes = [8, 8], strides = [1, 1]} : vector<64x16xf32> to vector<8x8xf32>
    %cst_20 = arith.constant dense<0.000000e+00> : vector<8x8xf32>
    %23 = tpu.matmul %21, %22, %cst_20 {dimension_numbers = #tpu.dot_dimension_numbers<[1], [0], [0], [1], [0, 0, 1, 1], [], []>} : vector<8x8xf32>, vector<8x8xf32>, vector<8x8xf32> -> vector<8x8xf32>
    %cst_21 = arith.constant dense<0xFF800000> : vector<8xf32>
    %24 = vector.multi_reduction <maximumf>, %23, %cst_21 [1] : vector<8x8xf32> to vector<8xf32>
    %25 = vector.shape_cast %24 : vector<8xf32> to vector<8x1xf32>
    %26 = vector.broadcast %25 : vector<8x1xf32> to vector<8x8xf32>
    %27 = arith.subf %23, %26 : vector<8x8xf32>
    %28 = math.exp %27 : vector<8x8xf32>
    %cst_22 = arith.constant dense<0.000000e+00> : vector<8xf32>
    %29 = vector.multi_reduction <add>, %28, %cst_22 [1] : vector<8x8xf32> to vector<8xf32>
    %30 = vector.shape_cast %29 : vector<8xf32> to vector<8x1xf32>
    %31 = vector.broadcast %30 : vector<8x1xf32> to vector<8x8xf32>
    %32 = arith.divf %28, %31 : vector<8x8xf32>
    %33 = vector.extract_strided_slice %17 {offsets = [0, 0], sizes = [8, 8], strides = [1, 1]} : vector<16x64xf32> to vector<8x8xf32>
    %cst_23 = arith.constant dense<0.000000e+00> : vector<8x8xf32>
    %34 = tpu.matmul %32, %33, %cst_23 {dimension_numbers = #tpu.dot_dimension_numbers<[1], [0], [0], [1], [0, 0, 1, 1], [], []>} : vector<8x8xf32>, vector<8x8xf32>, vector<8x8xf32> -> vector<8x8xf32>
    %c0_24 = arith.constant 0 : index
    %c0_25 = arith.constant 0 : index
    %35 = vector.load %arg13[%c0_24, %c0_25] : memref<16x64xf32, #tpu.memory_space<vmem>>, vector<8x8xf32>
    tpu.vector_store %arg13[%c0_24, %c0_25], %34 {strides = array<i32>} : memref<16x64xf32, #tpu.memory_space<vmem>>, vector<8x8xf32>,
    %36 = vector.extract_strided_slice %19 {offsets = [0, 8], sizes = [8, 8], strides = [1, 1]} : vector<16x64xf32> to vector<8x8xf32>
    %37 = vector.extract_strided_slice %20 {offsets = [8, 0], sizes = [8, 8], strides = [1, 1]} : vector<64x16xf32> to vector<8x8xf32>
    %cst_26 = arith.constant dense<0.000000e+00> : vector<8x8xf32>
    %38 = tpu.matmul %36, %37, %cst_26 {dimension_numbers = #tpu.dot_dimension_numbers<[1], [0], [0], [1], [0, 0, 1, 1], [], []>} : vector<8x8xf32>, vector<8x8xf32>, vector<8x8xf32> -> vector<8x8xf32>
    %cst_27 = arith.constant dense<0xFF800000> : vector<8xf32>
    %39 = vector.multi_reduction <maximumf>, %38, %cst_27 [1] : vector<8x8xf32> to vector<8xf32>
    %40 = vector.shape_cast %39 : vector<8xf32> to vector<8x1xf32>
    %41 = vector.broadcast %40 : vector<8x1xf32> to vector<8x8xf32>
    %42 = arith.subf %38, %41 : vector<8x8xf32>
    %43 = math.exp %42 : vector<8x8xf32>
    %cst_28 = arith.constant dense<0.000000e+00> : vector<8xf32>
    %44 = vector.multi_reduction <add>, %43, %cst_28 [1] : vector<8x8xf32> to vector<8xf32>
    %45 = vector.shape_cast %44 : vector<8xf32> to vector<8x1xf32>
    %46 = vector.broadcast %45 : vector<8x1xf32> to vector<8x8xf32>
    %47 = arith.divf %43, %46 : vector<8x8xf32>
    %48 = vector.extract_strided_slice %17 {offsets = [0, 8], sizes = [8, 8], strides = [1, 1]} : vector<16x64xf32> to vector<8x8xf32>
    %cst_29 = arith.constant dense<0.000000e+00> : vector<8x8xf32>
    %49 = tpu.matmul %47, %48, %cst_29 {dimension_numbers = #tpu.dot_dimension_numbers<[1], [0], [0], [1], [0, 0, 1, 1], [], []>} : vector<8x8xf32>, vector<8x8xf32>, vector<8x8xf32> -> vector<8x8xf32>
    %c0_30 = arith.constant 0 : index
    %c8 = arith.constant 8 : index
    %50 = vector.load %arg13[%c0_30, %c8] : memref<16x64xf32, #tpu.memory_space<vmem>>, vector<8x8xf32>
    tpu.vector_store %arg13[%c0_30, %c8], %49 {strides = array<i32>} : memref<16x64xf32, #tpu.memory_space<vmem>>, vector<8x8xf32>,
    %51 = vector.extract_strided_slice %19 {offsets = [0, 16], sizes = [8, 8], strides = [1, 1]} : vector<16x64xf32> to vector<8x8xf32>
    %52 = vector.extract_strided_slice %20 {offsets = [16, 0], sizes = [8, 8], strides = [1, 1]} : vector<64x16xf32> to vector<8x8xf32>
    %cst_31 = arith.constant dense<0.000000e+00> : vector<8x8xf32>
    %53 = tpu.matmul %51, %52, %cst_31 {dimension_numbers = #tpu.dot_dimension_numbers<[1], [0], [0], [1], [0, 0, 1, 1], [], []>} : vector<8x8xf32>, vector<8x8xf32>, vector<8x8xf32> -> vector<8x8xf32>
    %cst_32 = arith.constant dense<0xFF800000> : vector<8xf32>
    %54 = vector.multi_reduction <maximumf>, %53, %cst_32 [1] : vector<8x8xf32> to vector<8xf32>
    %55 = vector.shape_cast %54 : vector<8xf32> to vector<8x1xf32>
    %56 = vector.broadcast %55 : vector<8x1xf32> to vector<8x8xf32>
    %57 = arith.subf %53, %56 : vector<8x8xf32>
    %58 = math.exp %57 : vector<8x8xf32>
    %cst_33 = arith.constant dense<0.000000e+00> : vector<8xf32>
    %59 = vector.multi_reduction <add>, %58, %cst_33 [1] : vector<8x8xf32> to vector<8xf32>
    %60 = vector.shape_cast %59 : vector<8xf32> to vector<8x1xf32>
    %61 = vector.broadcast %60 : vector<8x1xf32> to vector<8x8xf32>
    %62 = arith.divf %58, %61 : vector<8x8xf32>
    %63 = vector.extract_strided_slice %17 {offsets = [0, 16], sizes = [8, 8], strides = [1, 1]} : vector<16x64xf32> to vector<8x8xf32>
    %cst_34 = arith.constant dense<0.000000e+00> : vector<8x8xf32>
    %64 = tpu.matmul %62, %63, %cst_34 {dimension_numbers = #tpu.dot_dimension_numbers<[1], [0], [0], [1], [0, 0, 1, 1], [], []>} : vector<8x8xf32>, vector<8x8xf32>, vector<8x8xf32> -> vector<8x8xf32>
    %c0_35 = arith.constant 0 : index
    %c16 = arith.constant 16 : index
    %65 = vector.load %arg13[%c0_35, %c16] : memref<16x64xf32, #tpu.memory_space<vmem>>, vector<8x8xf32>
    tpu.vector_store %arg13[%c0_35, %c16], %64 {strides = array<i32>} : memref<16x64xf32, #tpu.memory_space<vmem>>, vector<8x8xf32>,
    %66 = vector.extract_strided_slice %19 {offsets = [0, 24], sizes = [8, 8], strides = [1, 1]} : vector<16x64xf32> to vector<8x8xf32>
    %67 = vector.extract_strided_slice %20 {offsets = [24, 0], sizes = [8, 8], strides = [1, 1]} : vector<64x16xf32> to vector<8x8xf32>
    %cst_36 = arith.constant dense<0.000000e+00> : vector<8x8xf32>
    %68 = tpu.matmul %66, %67, %cst_36 {dimension_numbers = #tpu.dot_dimension_numbers<[1], [0], [0], [1], [0, 0, 1, 1], [], []>} : vector<8x8xf32>, vector<8x8xf32>, vector<8x8xf32> -> vector<8x8xf32>
    %cst_37 = arith.constant dense<0xFF800000> : vector<8xf32>
    %69 = vector.multi_reduction <maximumf>, %68, %cst_37 [1] : vector<8x8xf32> to vector<8xf32>
    %70 = vector.shape_cast %69 : vector<8xf32> to vector<8x1xf32>
    %71 = vector.broadcast %70 : vector<8x1xf32> to vector<8x8xf32>
    %72 = arith.subf %68, %71 : vector<8x8xf32>
    %73 = math.exp %72 : vector<8x8xf32>
    %cst_38 = arith.constant dense<0.000000e+00> : vector<8xf32>
    %74 = vector.multi_reduction <add>, %73, %cst_38 [1] : vector<8x8xf32> to vector<8xf32>
    %75 = vector.shape_cast %74 : vector<8xf32> to vector<8x1xf32>
    %76 = vector.broadcast %75 : vector<8x1xf32> to vector<8x8xf32>
    %77 = arith.divf %73, %76 : vector<8x8xf32>
    %78 = vector.extract_strided_slice %17 {offsets = [0, 24], sizes = [8, 8], strides = [1, 1]} : vector<16x64xf32> to vector<8x8xf32>
    %cst_39 = arith.constant dense<0.000000e+00> : vector<8x8xf32>
    %79 = tpu.matmul %77, %78, %cst_39 {dimension_numbers = #tpu.dot_dimension_numbers<[1], [0], [0], [1], [0, 0, 1, 1], [], []>} : vector<8x8xf32>, vector<8x8xf32>, vector<8x8xf32> -> vector<8x8xf32>
    %c0_40 = arith.constant 0 : index
    %c24 = arith.constant 24 : index
    %80 = vector.load %arg13[%c0_40, %c24] : memref<16x64xf32, #tpu.memory_space<vmem>>, vector<8x8xf32>
    tpu.vector_store %arg13[%c0_40, %c24], %79 {strides = array<i32>} : memref<16x64xf32, #tpu.memory_space<vmem>>, vector<8x8xf32>,
    %81 = vector.extract_strided_slice %19 {offsets = [0, 32], sizes = [8, 8], strides = [1, 1]} : vector<16x64xf32> to vector<8x8xf32>
    %82 = vector.extract_strided_slice %20 {offsets = [32, 0], sizes = [8, 8], strides = [1, 1]} : vector<64x16xf32> to vector<8x8xf32>
    %cst_41 = arith.constant dense<0.000000e+00> : vector<8x8xf32>
    %83 = tpu.matmul %81, %82, %cst_41 {dimension_numbers = #tpu.dot_dimension_numbers<[1], [0], [0], [1], [0, 0, 1, 1], [], []>} : vector<8x8xf32>, vector<8x8xf32>, vector<8x8xf32> -> vector<8x8xf32>
    %cst_42 = arith.constant dense<0xFF800000> : vector<8xf32>
    %84 = vector.multi_reduction <maximumf>, %83, %cst_42 [1] : vector<8x8xf32> to vector<8xf32>
    %85 = vector.shape_cast %84 : vector<8xf32> to vector<8x1xf32>
    %86 = vector.broadcast %85 : vector<8x1xf32> to vector<8x8xf32>
    %87 = arith.subf %83, %86 : vector<8x8xf32>
    %88 = math.exp %87 : vector<8x8xf32>
    %cst_43 = arith.constant dense<0.000000e+00> : vector<8xf32>
    %89 = vector.multi_reduction <add>, %88, %cst_43 [1] : vector<8x8xf32> to vector<8xf32>
    %90 = vector.shape_cast %89 : vector<8xf32> to vector<8x1xf32>
    %91 = vector.broadcast %90 : vector<8x1xf32> to vector<8x8xf32>
    %92 = arith.divf %88, %91 : vector<8x8xf32>
    %93 = vector.extract_strided_slice %17 {offsets = [0, 32], sizes = [8, 8], strides = [1, 1]} : vector<16x64xf32> to vector<8x8xf32>
    %cst_44 = arith.constant dense<0.000000e+00> : vector<8x8xf32>
    %94 = tpu.matmul %92, %93, %cst_44 {dimension_numbers = #tpu.dot_dimension_numbers<[1], [0], [0], [1], [0, 0, 1, 1], [], []>} : vector<8x8xf32>, vector<8x8xf32>, vector<8x8xf32> -> vector<8x8xf32>
    %c0_45 = arith.constant 0 : index
    %c32 = arith.constant 32 : index
    %95 = vector.load %arg13[%c0_45, %c32] : memref<16x64xf32, #tpu.memory_space<vmem>>, vector<8x8xf32>
    tpu.vector_store %arg13[%c0_45, %c32], %94 {strides = array<i32>} : memref<16x64xf32, #tpu.memory_space<vmem>>, vector<8x8xf32>,
    %96 = vector.extract_strided_slice %19 {offsets = [0, 40], sizes = [8, 8], strides = [1, 1]} : vector<16x64xf32> to vector<8x8xf32>
    %97 = vector.extract_strided_slice %20 {offsets = [40, 0], sizes = [8, 8], strides = [1, 1]} : vector<64x16xf32> to vector<8x8xf32>
    %cst_46 = arith.constant dense<0.000000e+00> : vector<8x8xf32>
    %98 = tpu.matmul %96, %97, %cst_46 {dimension_numbers = #tpu.dot_dimension_numbers<[1], [0], [0], [1], [0, 0, 1, 1], [], []>} : vector<8x8xf32>, vector<8x8xf32>, vector<8x8xf32> -> vector<8x8xf32>
    %cst_47 = arith.constant dense<0xFF800000> : vector<8xf32>
    %99 = vector.multi_reduction <maximumf>, %98, %cst_47 [1] : vector<8x8xf32> to vector<8xf32>
    %100 = vector.shape_cast %99 : vector<8xf32> to vector<8x1xf32>
    %101 = vector.broadcast %100 : vector<8x1xf32> to vector<8x8xf32>
    %102 = arith.subf %98, %101 : vector<8x8xf32>
    %103 = math.exp %102 : vector<8x8xf32>
    %cst_48 = arith.constant dense<0.000000e+00> : vector<8xf32>
    %104 = vector.multi_reduction <add>, %103, %cst_48 [1] : vector<8x8xf32> to vector<8xf32>
    %105 = vector.shape_cast %104 : vector<8xf32> to vector<8x1xf32>
    %106 = vector.broadcast %105 : vector<8x1xf32> to vector<8x8xf32>
    %107 = arith.divf %103, %106 : vector<8x8xf32>
    %108 = vector.extract_strided_slice %17 {offsets = [0, 40], sizes = [8, 8], strides = [1, 1]} : vector<16x64xf32> to vector<8x8xf32>
    %cst_49 = arith.constant dense<0.000000e+00> : vector<8x8xf32>
    %109 = tpu.matmul %107, %108, %cst_49 {dimension_numbers = #tpu.dot_dimension_numbers<[1], [0], [0], [1], [0, 0, 1, 1], [], []>} : vector<8x8xf32>, vector<8x8xf32>, vector<8x8xf32> -> vector<8x8xf32>
    %c0_50 = arith.constant 0 : index
    %c40 = arith.constant 40 : index
    %110 = vector.load %arg13[%c0_50, %c40] : memref<16x64xf32, #tpu.memory_space<vmem>>, vector<8x8xf32>
    tpu.vector_store %arg13[%c0_50, %c40], %109 {strides = array<i32>} : memref<16x64xf32, #tpu.memory_space<vmem>>, vector<8x8xf32>,
    %111 = vector.extract_strided_slice %19 {offsets = [0, 48], sizes = [8, 8], strides = [1, 1]} : vector<16x64xf32> to vector<8x8xf32>
    %112 = vector.extract_strided_slice %20 {offsets = [48, 0], sizes = [8, 8], strides = [1, 1]} : vector<64x16xf32> to vector<8x8xf32>
    %cst_51 = arith.constant dense<0.000000e+00> : vector<8x8xf32>
    %113 = tpu.matmul %111, %112, %cst_51 {dimension_numbers = #tpu.dot_dimension_numbers<[1], [0], [0], [1], [0, 0, 1, 1], [], []>} : vector<8x8xf32>, vector<8x8xf32>, vector<8x8xf32> -> vector<8x8xf32>
    %cst_52 = arith.constant dense<0xFF800000> : vector<8xf32>
    %114 = vector.multi_reduction <maximumf>, %113, %cst_52 [1] : vector<8x8xf32> to vector<8xf32>
    %115 = vector.shape_cast %114 : vector<8xf32> to vector<8x1xf32>
    %116 = vector.broadcast %115 : vector<8x1xf32> to vector<8x8xf32>
    %117 = arith.subf %113, %116 : vector<8x8xf32>
    %118 = math.exp %117 : vector<8x8xf32>
    %cst_53 = arith.constant dense<0.000000e+00> : vector<8xf32>
    %119 = vector.multi_reduction <add>, %118, %cst_53 [1] : vector<8x8xf32> to vector<8xf32>
    %120 = vector.shape_cast %119 : vector<8xf32> to vector<8x1xf32>
    %121 = vector.broadcast %120 : vector<8x1xf32> to vector<8x8xf32>
    %122 = arith.divf %118, %121 : vector<8x8xf32>
    %123 = vector.extract_strided_slice %17 {offsets = [0, 48], sizes = [8, 8], strides = [1, 1]} : vector<16x64xf32> to vector<8x8xf32>
    %cst_54 = arith.constant dense<0.000000e+00> : vector<8x8xf32>
    %124 = tpu.matmul %122, %123, %cst_54 {dimension_numbers = #tpu.dot_dimension_numbers<[1], [0], [0], [1], [0, 0, 1, 1], [], []>} : vector<8x8xf32>, vector<8x8xf32>, vector<8x8xf32> -> vector<8x8xf32>
    %c0_55 = arith.constant 0 : index
    %c48 = arith.constant 48 : index
    %125 = vector.load %arg13[%c0_55, %c48] : memref<16x64xf32, #tpu.memory_space<vmem>>, vector<8x8xf32>
    tpu.vector_store %arg13[%c0_55, %c48], %124 {strides = array<i32>} : memref<16x64xf32, #tpu.memory_space<vmem>>, vector<8x8xf32>,
    %126 = vector.extract_strided_slice %19 {offsets = [0, 56], sizes = [8, 8], strides = [1, 1]} : vector<16x64xf32> to vector<8x8xf32>
    %127 = vector.extract_strided_slice %20 {offsets = [56, 0], sizes = [8, 8], strides = [1, 1]} : vector<64x16xf32> to vector<8x8xf32>
    %cst_56 = arith.constant dense<0.000000e+00> : vector<8x8xf32>
    %128 = tpu.matmul %126, %127, %cst_56 {dimension_numbers = #tpu.dot_dimension_numbers<[1], [0], [0], [1], [0, 0, 1, 1], [], []>} : vector<8x8xf32>, vector<8x8xf32>, vector<8x8xf32> -> vector<8x8xf32>
    %cst_57 = arith.constant dense<0xFF800000> : vector<8xf32>
    %129 = vector.multi_reduction <maximumf>, %128, %cst_57 [1] : vector<8x8xf32> to vector<8xf32>
    %130 = vector.shape_cast %129 : vector<8xf32> to vector<8x1xf32>
    %131 = vector.broadcast %130 : vector<8x1xf32> to vector<8x8xf32>
    %132 = arith.subf %128, %131 : vector<8x8xf32>
    %133 = math.exp %132 : vector<8x8xf32>
    %cst_58 = arith.constant dense<0.000000e+00> : vector<8xf32>
    %134 = vector.multi_reduction <add>, %133, %cst_58 [1] : vector<8x8xf32> to vector<8xf32>
    %135 = vector.shape_cast %134 : vector<8xf32> to vector<8x1xf32>
    %136 = vector.broadcast %135 : vector<8x1xf32> to vector<8x8xf32>
    %137 = arith.divf %133, %136 : vector<8x8xf32>
    %138 = vector.extract_strided_slice %17 {offsets = [0, 56], sizes = [8, 8], strides = [1, 1]} : vector<16x64xf32> to vector<8x8xf32>
    %cst_59 = arith.constant dense<0.000000e+00> : vector<8x8xf32>
    %139 = tpu.matmul %137, %138, %cst_59 {dimension_numbers = #tpu.dot_dimension_numbers<[1], [0], [0], [1], [0, 0, 1, 1], [], []>} : vector<8x8xf32>, vector<8x8xf32>, vector<8x8xf32> -> vector<8x8xf32>
    %c0_60 = arith.constant 0 : index
    %c56 = arith.constant 56 : index
    %140 = vector.load %arg13[%c0_60, %c56] : memref<16x64xf32, #tpu.memory_space<vmem>>, vector<8x8xf32>
    tpu.vector_store %arg13[%c0_60, %c56], %139 {strides = array<i32>} : memref<16x64xf32, #tpu.memory_space<vmem>>, vector<8x8xf32>,
    %141 = vector.extract_strided_slice %19 {offsets = [8, 0], sizes = [8, 8], strides = [1, 1]} : vector<16x64xf32> to vector<8x8xf32>
    %142 = vector.extract_strided_slice %20 {offsets = [0, 8], sizes = [8, 8], strides = [1, 1]} : vector<64x16xf32> to vector<8x8xf32>
    %cst_61 = arith.constant dense<0.000000e+00> : vector<8x8xf32>
    %143 = tpu.matmul %141, %142, %cst_61 {dimension_numbers = #tpu.dot_dimension_numbers<[1], [0], [0], [1], [0, 0, 1, 1], [], []>} : vector<8x8xf32>, vector<8x8xf32>, vector<8x8xf32> -> vector<8x8xf32>
    %cst_62 = arith.constant dense<0xFF800000> : vector<8xf32>
    %144 = vector.multi_reduction <maximumf>, %143, %cst_62 [1] : vector<8x8xf32> to vector<8xf32>
    %145 = vector.shape_cast %144 : vector<8xf32> to vector<8x1xf32>
    %146 = vector.broadcast %145 : vector<8x1xf32> to vector<8x8xf32>
    %147 = arith.subf %143, %146 : vector<8x8xf32>
    %148 = math.exp %147 : vector<8x8xf32>
    %cst_63 = arith.constant dense<0.000000e+00> : vector<8xf32>
    %149 = vector.multi_reduction <add>, %148, %cst_63 [1] : vector<8x8xf32> to vector<8xf32>
    %150 = vector.shape_cast %149 : vector<8xf32> to vector<8x1xf32>
    %151 = vector.broadcast %150 : vector<8x1xf32> to vector<8x8xf32>
    %152 = arith.divf %148, %151 : vector<8x8xf32>
    %153 = vector.extract_strided_slice %17 {offsets = [8, 0], sizes = [8, 8], strides = [1, 1]} : vector<16x64xf32> to vector<8x8xf32>
    %cst_64 = arith.constant dense<0.000000e+00> : vector<8x8xf32>
    %154 = tpu.matmul %152, %153, %cst_64 {dimension_numbers = #tpu.dot_dimension_numbers<[1], [0], [0], [1], [0, 0, 1, 1], [], []>} : vector<8x8xf32>, vector<8x8xf32>, vector<8x8xf32> -> vector<8x8xf32>
    %c8_65 = arith.constant 8 : index
    %c0_66 = arith.constant 0 : index
    %155 = vector.load %arg13[%c8_65, %c0_66] : memref<16x64xf32, #tpu.memory_space<vmem>>, vector<8x8xf32>
    tpu.vector_store %arg13[%c8_65, %c0_66], %154 {strides = array<i32>} : memref<16x64xf32, #tpu.memory_space<vmem>>, vector<8x8xf32>,
    %156 = vector.extract_strided_slice %19 {offsets = [8, 8], sizes = [8, 8], strides = [1, 1]} : vector<16x64xf32> to vector<8x8xf32>
    %157 = vector.extract_strided_slice %20 {offsets = [8, 8], sizes = [8, 8], strides = [1, 1]} : vector<64x16xf32> to vector<8x8xf32>
    %cst_67 = arith.constant dense<0.000000e+00> : vector<8x8xf32>
    %158 = tpu.matmul %156, %157, %cst_67 {dimension_numbers = #tpu.dot_dimension_numbers<[1], [0], [0], [1], [0, 0, 1, 1], [], []>} : vector<8x8xf32>, vector<8x8xf32>, vector<8x8xf32> -> vector<8x8xf32>
    %cst_68 = arith.constant dense<0xFF800000> : vector<8xf32>
    %159 = vector.multi_reduction <maximumf>, %158, %cst_68 [1] : vector<8x8xf32> to vector<8xf32>
    %160 = vector.shape_cast %159 : vector<8xf32> to vector<8x1xf32>
    %161 = vector.broadcast %160 : vector<8x1xf32> to vector<8x8xf32>
    %162 = arith.subf %158, %161 : vector<8x8xf32>
    %163 = math.exp %162 : vector<8x8xf32>
    %cst_69 = arith.constant dense<0.000000e+00> : vector<8xf32>
    %164 = vector.multi_reduction <add>, %163, %cst_69 [1] : vector<8x8xf32> to vector<8xf32>
    %165 = vector.shape_cast %164 : vector<8xf32> to vector<8x1xf32>
    %166 = vector.broadcast %165 : vector<8x1xf32> to vector<8x8xf32>
    %167 = arith.divf %163, %166 : vector<8x8xf32>
    %168 = vector.extract_strided_slice %17 {offsets = [8, 8], sizes = [8, 8], strides = [1, 1]} : vector<16x64xf32> to vector<8x8xf32>
    %cst_70 = arith.constant dense<0.000000e+00> : vector<8x8xf32>
    %169 = tpu.matmul %167, %168, %cst_70 {dimension_numbers = #tpu.dot_dimension_numbers<[1], [0], [0], [1], [0, 0, 1, 1], [], []>} : vector<8x8xf32>, vector<8x8xf32>, vector<8x8xf32> -> vector<8x8xf32>
    %c8_71 = arith.constant 8 : index
    %c8_72 = arith.constant 8 : index
    %170 = vector.load %arg13[%c8_71, %c8_72] : memref<16x64xf32, #tpu.memory_space<vmem>>, vector<8x8xf32>
    tpu.vector_store %arg13[%c8_71, %c8_72], %169 {strides = array<i32>} : memref<16x64xf32, #tpu.memory_space<vmem>>, vector<8x8xf32>,
    %171 = vector.extract_strided_slice %19 {offsets = [8, 16], sizes = [8, 8], strides = [1, 1]} : vector<16x64xf32> to vector<8x8xf32>
    %172 = vector.extract_strided_slice %20 {offsets = [16, 8], sizes = [8, 8], strides = [1, 1]} : vector<64x16xf32> to vector<8x8xf32>
    %cst_73 = arith.constant dense<0.000000e+00> : vector<8x8xf32>
    %173 = tpu.matmul %171, %172, %cst_73 {dimension_numbers = #tpu.dot_dimension_numbers<[1], [0], [0], [1], [0, 0, 1, 1], [], []>} : vector<8x8xf32>, vector<8x8xf32>, vector<8x8xf32> -> vector<8x8xf32>
    %cst_74 = arith.constant dense<0xFF800000> : vector<8xf32>
    %174 = vector.multi_reduction <maximumf>, %173, %cst_74 [1] : vector<8x8xf32> to vector<8xf32>
    %175 = vector.shape_cast %174 : vector<8xf32> to vector<8x1xf32>
    %176 = vector.broadcast %175 : vector<8x1xf32> to vector<8x8xf32>
    %177 = arith.subf %173, %176 : vector<8x8xf32>
    %178 = math.exp %177 : vector<8x8xf32>
    %cst_75 = arith.constant dense<0.000000e+00> : vector<8xf32>
    %179 = vector.multi_reduction <add>, %178, %cst_75 [1] : vector<8x8xf32> to vector<8xf32>
    %180 = vector.shape_cast %179 : vector<8xf32> to vector<8x1xf32>
    %181 = vector.broadcast %180 : vector<8x1xf32> to vector<8x8xf32>
    %182 = arith.divf %178, %181 : vector<8x8xf32>
    %183 = vector.extract_strided_slice %17 {offsets = [8, 16], sizes = [8, 8], strides = [1, 1]} : vector<16x64xf32> to vector<8x8xf32>
    %cst_76 = arith.constant dense<0.000000e+00> : vector<8x8xf32>
    %184 = tpu.matmul %182, %183, %cst_76 {dimension_numbers = #tpu.dot_dimension_numbers<[1], [0], [0], [1], [0, 0, 1, 1], [], []>} : vector<8x8xf32>, vector<8x8xf32>, vector<8x8xf32> -> vector<8x8xf32>
    %c8_77 = arith.constant 8 : index
    %c16_78 = arith.constant 16 : index
    %185 = vector.load %arg13[%c8_77, %c16_78] : memref<16x64xf32, #tpu.memory_space<vmem>>, vector<8x8xf32>
    tpu.vector_store %arg13[%c8_77, %c16_78], %184 {strides = array<i32>} : memref<16x64xf32, #tpu.memory_space<vmem>>, vector<8x8xf32>,
    %186 = vector.extract_strided_slice %19 {offsets = [8, 24], sizes = [8, 8], strides = [1, 1]} : vector<16x64xf32> to vector<8x8xf32>
    %187 = vector.extract_strided_slice %20 {offsets = [24, 8], sizes = [8, 8], strides = [1, 1]} : vector<64x16xf32> to vector<8x8xf32>
    %cst_79 = arith.constant dense<0.000000e+00> : vector<8x8xf32>
    %188 = tpu.matmul %186, %187, %cst_79 {dimension_numbers = #tpu.dot_dimension_numbers<[1], [0], [0], [1], [0, 0, 1, 1], [], []>} : vector<8x8xf32>, vector<8x8xf32>, vector<8x8xf32> -> vector<8x8xf32>
    %cst_80 = arith.constant dense<0xFF800000> : vector<8xf32>
    %189 = vector.multi_reduction <maximumf>, %188, %cst_80 [1] : vector<8x8xf32> to vector<8xf32>
    %190 = vector.shape_cast %189 : vector<8xf32> to vector<8x1xf32>
    %191 = vector.broadcast %190 : vector<8x1xf32> to vector<8x8xf32>
    %192 = arith.subf %188, %191 : vector<8x8xf32>
    %193 = math.exp %192 : vector<8x8xf32>
    %cst_81 = arith.constant dense<0.000000e+00> : vector<8xf32>
    %194 = vector.multi_reduction <add>, %193, %cst_81 [1] : vector<8x8xf32> to vector<8xf32>
    %195 = vector.shape_cast %194 : vector<8xf32> to vector<8x1xf32>
    %196 = vector.broadcast %195 : vector<8x1xf32> to vector<8x8xf32>
    %197 = arith.divf %193, %196 : vector<8x8xf32>
    %198 = vector.extract_strided_slice %17 {offsets = [8, 24], sizes = [8, 8], strides = [1, 1]} : vector<16x64xf32> to vector<8x8xf32>
    %cst_82 = arith.constant dense<0.000000e+00> : vector<8x8xf32>
    %199 = tpu.matmul %197, %198, %cst_82 {dimension_numbers = #tpu.dot_dimension_numbers<[1], [0], [0], [1], [0, 0, 1, 1], [], []>} : vector<8x8xf32>, vector<8x8xf32>, vector<8x8xf32> -> vector<8x8xf32>
    %c8_83 = arith.constant 8 : index
    %c24_84 = arith.constant 24 : index
    %200 = vector.load %arg13[%c8_83, %c24_84] : memref<16x64xf32, #tpu.memory_space<vmem>>, vector<8x8xf32>
    tpu.vector_store %arg13[%c8_83, %c24_84], %199 {strides = array<i32>} : memref<16x64xf32, #tpu.memory_space<vmem>>, vector<8x8xf32>,
    %201 = vector.extract_strided_slice %19 {offsets = [8, 32], sizes = [8, 8], strides = [1, 1]} : vector<16x64xf32> to vector<8x8xf32>
    %202 = vector.extract_strided_slice %20 {offsets = [32, 8], sizes = [8, 8], strides = [1, 1]} : vector<64x16xf32> to vector<8x8xf32>
    %cst_85 = arith.constant dense<0.000000e+00> : vector<8x8xf32>
    %203 = tpu.matmul %201, %202, %cst_85 {dimension_numbers = #tpu.dot_dimension_numbers<[1], [0], [0], [1], [0, 0, 1, 1], [], []>} : vector<8x8xf32>, vector<8x8xf32>, vector<8x8xf32> -> vector<8x8xf32>
    %cst_86 = arith.constant dense<0xFF800000> : vector<8xf32>
    %204 = vector.multi_reduction <maximumf>, %203, %cst_86 [1] : vector<8x8xf32> to vector<8xf32>
    %205 = vector.shape_cast %204 : vector<8xf32> to vector<8x1xf32>
    %206 = vector.broadcast %205 : vector<8x1xf32> to vector<8x8xf32>
    %207 = arith.subf %203, %206 : vector<8x8xf32>
    %208 = math.exp %207 : vector<8x8xf32>
    %cst_87 = arith.constant dense<0.000000e+00> : vector<8xf32>
    %209 = vector.multi_reduction <add>, %208, %cst_87 [1] : vector<8x8xf32> to vector<8xf32>
    %210 = vector.shape_cast %209 : vector<8xf32> to vector<8x1xf32>
    %211 = vector.broadcast %210 : vector<8x1xf32> to vector<8x8xf32>
    %212 = arith.divf %208, %211 : vector<8x8xf32>
    %213 = vector.extract_strided_slice %17 {offsets = [8, 32], sizes = [8, 8], strides = [1, 1]} : vector<16x64xf32> to vector<8x8xf32>
    %cst_88 = arith.constant dense<0.000000e+00> : vector<8x8xf32>
    %214 = tpu.matmul %212, %213, %cst_88 {dimension_numbers = #tpu.dot_dimension_numbers<[1], [0], [0], [1], [0, 0, 1, 1], [], []>} : vector<8x8xf32>, vector<8x8xf32>, vector<8x8xf32> -> vector<8x8xf32>
    %c8_89 = arith.constant 8 : index
    %c32_90 = arith.constant 32 : index
    %215 = vector.load %arg13[%c8_89, %c32_90] : memref<16x64xf32, #tpu.memory_space<vmem>>, vector<8x8xf32>
    tpu.vector_store %arg13[%c8_89, %c32_90], %214 {strides = array<i32>} : memref<16x64xf32, #tpu.memory_space<vmem>>, vector<8x8xf32>,
    %216 = vector.extract_strided_slice %19 {offsets = [8, 40], sizes = [8, 8], strides = [1, 1]} : vector<16x64xf32> to vector<8x8xf32>
    %217 = vector.extract_strided_slice %20 {offsets = [40, 8], sizes = [8, 8], strides = [1, 1]} : vector<64x16xf32> to vector<8x8xf32>
    %cst_91 = arith.constant dense<0.000000e+00> : vector<8x8xf32>
    %218 = tpu.matmul %216, %217, %cst_91 {dimension_numbers = #tpu.dot_dimension_numbers<[1], [0], [0], [1], [0, 0, 1, 1], [], []>} : vector<8x8xf32>, vector<8x8xf32>, vector<8x8xf32> -> vector<8x8xf32>
    %cst_92 = arith.constant dense<0xFF800000> : vector<8xf32>
    %219 = vector.multi_reduction <maximumf>, %218, %cst_92 [1] : vector<8x8xf32> to vector<8xf32>
    %220 = vector.shape_cast %219 : vector<8xf32> to vector<8x1xf32>
    %221 = vector.broadcast %220 : vector<8x1xf32> to vector<8x8xf32>
    %222 = arith.subf %218, %221 : vector<8x8xf32>
    %223 = math.exp %222 : vector<8x8xf32>
    %cst_93 = arith.constant dense<0.000000e+00> : vector<8xf32>
    %224 = vector.multi_reduction <add>, %223, %cst_93 [1] : vector<8x8xf32> to vector<8xf32>
    %225 = vector.shape_cast %224 : vector<8xf32> to vector<8x1xf32>
    %226 = vector.broadcast %225 : vector<8x1xf32> to vector<8x8xf32>
    %227 = arith.divf %223, %226 : vector<8x8xf32>
    %228 = vector.extract_strided_slice %17 {offsets = [8, 40], sizes = [8, 8], strides = [1, 1]} : vector<16x64xf32> to vector<8x8xf32>
    %cst_94 = arith.constant dense<0.000000e+00> : vector<8x8xf32>
    %229 = tpu.matmul %227, %228, %cst_94 {dimension_numbers = #tpu.dot_dimension_numbers<[1], [0], [0], [1], [0, 0, 1, 1], [], []>} : vector<8x8xf32>, vector<8x8xf32>, vector<8x8xf32> -> vector<8x8xf32>
    %c8_95 = arith.constant 8 : index
    %c40_96 = arith.constant 40 : index
    %230 = vector.load %arg13[%c8_95, %c40_96] : memref<16x64xf32, #tpu.memory_space<vmem>>, vector<8x8xf32>
    tpu.vector_store %arg13[%c8_95, %c40_96], %229 {strides = array<i32>} : memref<16x64xf32, #tpu.memory_space<vmem>>, vector<8x8xf32>,
    %231 = vector.extract_strided_slice %19 {offsets = [8, 48], sizes = [8, 8], strides = [1, 1]} : vector<16x64xf32> to vector<8x8xf32>
    %232 = vector.extract_strided_slice %20 {offsets = [48, 8], sizes = [8, 8], strides = [1, 1]} : vector<64x16xf32> to vector<8x8xf32>
    %cst_97 = arith.constant dense<0.000000e+00> : vector<8x8xf32>
    %233 = tpu.matmul %231, %232, %cst_97 {dimension_numbers = #tpu.dot_dimension_numbers<[1], [0], [0], [1], [0, 0, 1, 1], [], []>} : vector<8x8xf32>, vector<8x8xf32>, vector<8x8xf32> -> vector<8x8xf32>
    %cst_98 = arith.constant dense<0xFF800000> : vector<8xf32>
    %234 = vector.multi_reduction <maximumf>, %233, %cst_98 [1] : vector<8x8xf32> to vector<8xf32>
    %235 = vector.shape_cast %234 : vector<8xf32> to vector<8x1xf32>
    %236 = vector.broadcast %235 : vector<8x1xf32> to vector<8x8xf32>
    %237 = arith.subf %233, %236 : vector<8x8xf32>
    %238 = math.exp %237 : vector<8x8xf32>
    %cst_99 = arith.constant dense<0.000000e+00> : vector<8xf32>
    %239 = vector.multi_reduction <add>, %238, %cst_99 [1] : vector<8x8xf32> to vector<8xf32>
    %240 = vector.shape_cast %239 : vector<8xf32> to vector<8x1xf32>
    %241 = vector.broadcast %240 : vector<8x1xf32> to vector<8x8xf32>
    %242 = arith.divf %238, %241 : vector<8x8xf32>
    %243 = vector.extract_strided_slice %17 {offsets = [8, 48], sizes = [8, 8], strides = [1, 1]} : vector<16x64xf32> to vector<8x8xf32>
    %cst_100 = arith.constant dense<0.000000e+00> : vector<8x8xf32>
    %244 = tpu.matmul %242, %243, %cst_100 {dimension_numbers = #tpu.dot_dimension_numbers<[1], [0], [0], [1], [0, 0, 1, 1], [], []>} : vector<8x8xf32>, vector<8x8xf32>, vector<8x8xf32> -> vector<8x8xf32>
    %c8_101 = arith.constant 8 : index
    %c48_102 = arith.constant 48 : index
    %245 = vector.load %arg13[%c8_101, %c48_102] : memref<16x64xf32, #tpu.memory_space<vmem>>, vector<8x8xf32>
    tpu.vector_store %arg13[%c8_101, %c48_102], %244 {strides = array<i32>} : memref<16x64xf32, #tpu.memory_space<vmem>>, vector<8x8xf32>,
    %246 = vector.extract_strided_slice %19 {offsets = [8, 56], sizes = [8, 8], strides = [1, 1]} : vector<16x64xf32> to vector<8x8xf32>
    %247 = vector.extract_strided_slice %20 {offsets = [56, 8], sizes = [8, 8], strides = [1, 1]} : vector<64x16xf32> to vector<8x8xf32>
    %cst_103 = arith.constant dense<0.000000e+00> : vector<8x8xf32>
    %248 = tpu.matmul %246, %247, %cst_103 {dimension_numbers = #tpu.dot_dimension_numbers<[1], [0], [0], [1], [0, 0, 1, 1], [], []>} : vector<8x8xf32>, vector<8x8xf32>, vector<8x8xf32> -> vector<8x8xf32>
    %cst_104 = arith.constant dense<0xFF800000> : vector<8xf32>
    %249 = vector.multi_reduction <maximumf>, %248, %cst_104 [1] : vector<8x8xf32> to vector<8xf32>
    %250 = vector.shape_cast %249 : vector<8xf32> to vector<8x1xf32>
    %251 = vector.broadcast %250 : vector<8x1xf32> to vector<8x8xf32>
    %252 = arith.subf %248, %251 : vector<8x8xf32>
    %253 = math.exp %252 : vector<8x8xf32>
    %cst_105 = arith.constant dense<0.000000e+00> : vector<8xf32>
    %254 = vector.multi_reduction <add>, %253, %cst_105 [1] : vector<8x8xf32> to vector<8xf32>
    %255 = vector.shape_cast %254 : vector<8xf32> to vector<8x1xf32>
    %256 = vector.broadcast %255 : vector<8x1xf32> to vector<8x8xf32>
    %257 = arith.divf %253, %256 : vector<8x8xf32>
    %258 = vector.extract_strided_slice %17 {offsets = [8, 56], sizes = [8, 8], strides = [1, 1]} : vector<16x64xf32> to vector<8x8xf32>
    %cst_106 = arith.constant dense<0.000000e+00> : vector<8x8xf32>
    %259 = tpu.matmul %257, %258, %cst_106 {dimension_numbers = #tpu.dot_dimension_numbers<[1], [0], [0], [1], [0, 0, 1, 1], [], []>} : vector<8x8xf32>, vector<8x8xf32>, vector<8x8xf32> -> vector<8x8xf32>
    %c8_107 = arith.constant 8 : index
    %c56_108 = arith.constant 56 : index
    %260 = vector.load %arg13[%c8_107, %c56_108] : memref<16x64xf32, #tpu.memory_space<vmem>>, vector<8x8xf32>
    tpu.vector_store %arg13[%c8_107, %c56_108], %259 {strides = array<i32>} : memref<16x64xf32, #tpu.memory_space<vmem>>, vector<8x8xf32>,
    %c0_109 = arith.constant 0 : index
    %c0_110 = arith.constant 0 : index
    %261 = vector.load %arg13[%c0_109, %c0_110] : memref<16x64xf32, #tpu.memory_space<vmem>>, vector<16x64xf32>
    %c0_111 = arith.constant 0 : index
    %c0_112 = arith.constant 0 : index
    %262 = vector.load %arg10[%c0_111, %c0_112] : memref<64x32xf32, #tpu.memory_space<vmem>>, vector<64x32xf32>
    %cst_113 = arith.constant dense<0.000000e+00> : vector<16x32xf32>
    %263 = tpu.matmul %261, %262, %cst_113 {dimension_numbers = #tpu.dot_dimension_numbers<[1], [0], [0], [1], [0, 0, 1, 1], [], []>} : vector<16x64xf32>, vector<64x32xf32>, vector<16x32xf32> -> vector<16x32xf32>
    %c0_114 = arith.constant 0 : index
    %c0_115 = arith.constant 0 : index
    %264 = vector.load %arg11[%c0_114, %c0_115] : memref<1x32xf32, #tpu.memory_space<vmem>>, vector<1x32xf32>
    %265 = vector.broadcast %264 : vector<1x32xf32> to vector<16x32xf32>
    %266 = arith.addf %263, %265 : vector<16x32xf32>
    %c0_116 = arith.constant 0 : index
    %c0_117 = arith.constant 0 : index
    %267 = vector.load %arg12[%c0_116, %c0_117] : memref<16x32xf32, #tpu.memory_space<vmem>>, vector<16x32xf32>
    tpu.vector_store %arg12[%c0_116, %c0_117], %266 {strides = array<i32>} : memref<16x32xf32, #tpu.memory_space<vmem>>, vector<16x32xf32>,
    return
  }
  func.func @transform_0(%arg0: i32) -> (i32, i32) {
    %c0_i32 = arith.constant 0 : i32
    %c0_i32_0 = arith.constant 0 : i32
    %c0_i32_1 = arith.constant 0 : i32
    return %c0_i32, %c0_i32_0 : i32, i32
  }
  func.func @transform_1(%arg0: i32) -> (i32, i32) {
    %c0_i32 = arith.constant 0 : i32
    %c0_i32_0 = arith.constant 0 : i32
    %c0_i32_1 = arith.constant 0 : i32
    return %c0_i32, %c0_i32_0 : i32, i32
  }
  func.func @transform_2(%arg0: i32) -> (i32, i32) {
    %c0_i32 = arith.constant 0 : i32
    %c0_i32_0 = arith.constant 0 : i32
    %c0_i32_1 = arith.constant 0 : i32
    return %c0_i32, %c0_i32_0 : i32, i32
  }
  func.func @transform_3(%arg0: i32) -> (i32, i32) {
    %c0_i32 = arith.constant 0 : i32
    %c0_i32_0 = arith.constant 0 : i32
    %c0_i32_1 = arith.constant 0 : i32
    return %c0_i32, %c0_i32_0 : i32, i32
  }
  func.func @transform_4(%arg0: i32) -> (i32, i32) {
    %c0_i32 = arith.constant 0 : i32
    %c0_i32_0 = arith.constant 0 : i32
    %c0_i32_1 = arith.constant 0 : i32
    return %c0_i32, %c0_i32_0 : i32, i32
  }
  func.func @transform_5(%arg0: i32) -> (i32, i32) {
    %c0_i32 = arith.constant 0 : i32
    %c0_i32_0 = arith.constant 0 : i32
    %c0_i32_1 = arith.constant 0 : i32
    return %c0_i32, %c0_i32_0 : i32, i32
  }
  func.func @transform_6(%arg0: i32) -> (i32, i32) {
    %c0_i32 = arith.constant 0 : i32
    %c0_i32_0 = arith.constant 0 : i32
    %c0_i32_1 = arith.constant 0 : i32
    return %c0_i32, %c0_i32_0 : i32, i32
  }
  func.func @transform_7(%arg0: i32) -> (i32, i32) {
    %c0_i32 = arith.constant 0 : i32
    %c0_i32_0 = arith.constant 0 : i32
    %c0_i32_1 = arith.constant 0 : i32
    return %c0_i32, %c0_i32_0 : i32, i32
  }
  func.func @transform_8(%arg0: i32) -> (i32, i32) {
    %c0_i32 = arith.constant 0 : i32
    %c0_i32_0 = arith.constant 0 : i32
    %c0_i32_1 = arith.constant 0 : i32
    return %c0_i32, %c0_i32_0 : i32, i32
  }
  func.func @transform_9(%arg0: i32) -> (i32, i32) {
    %c0_i32 = arith.constant 0 : i32
    %c0_i32_0 = arith.constant 0 : i32
    %c0_i32_1 = arith.constant 0 : i32
    return %c0_i32, %c0_i32_0 : i32, i32
  }
  func.func @transform_10(%arg0: i32) -> (i32, i32) {
    %c0_i32 = arith.constant 0 : i32
    %c0_i32_0 = arith.constant 0 : i32
    %c0_i32_1 = arith.constant 0 : i32
    return %c0_i32, %c0_i32_0 : i32, i32
  }
  func.func @transform_11(%arg0: i32) -> (i32, i32) {
    %c0_i32 = arith.constant 0 : i32
    %c0_i32_0 = arith.constant 0 : i32
    %c0_i32_1 = arith.constant 0 : i32
    return %c0_i32, %c0_i32_0 : i32, i32
  }
}

</mosaic_0001>

<bundles_post_ra>
// kernel: tpu_custom_call.1
= control target key start
LH: loop header
LB: loop body
LE: loop exit
PB: predicated region body
PF: predicated region fallthrough
CT: control target
= control target key end

     0   :  { %16 = vsyncpa [#allocation4], 0  ;;  %s4473_s0 = inlined_call_operand.hbm [shape: f32[16,32], index: 0, kind: input, shape index: {}]   ;;  %s4474_s1 = inlined_call_operand.hbm [shape: f32[16,32], index: 1, kind: input, shape index: {}]   ;;  %s4475_s2 = inlined_call_operand.hbm [shape: f32[16,32], index: 2, kind: input, shape index: {}]   ;;  %s4476_s3 = inlined_call_operand.vmem [shape: f32[32,64], index: 3, kind: input, shape index: {}]   ;;  %s4477_s4 = inlined_call_operand.vmem [shape: f32[1,64], index: 4, kind: input, shape index: {}]   ;;  %s4478_s5 = inlined_call_operand.vmem [shape: f32[32,64], index: 5, kind: input, shape index: {}]   ;;  %s4479_s6 = inlined_call_operand.vmem [shape: f32[1,64], index: 6, kind: input, shape index: {}]   ;;  %s4480_s7 = inlined_call_operand.vmem [shape: f32[32,64], index: 7, kind: input, shape index: {}]   ;;  %s4481_s8 = inlined_call_operand.hbm [shape: f32[1,64], index: 8, kind: input, shape index: {}]   ;;  %s4482_s9 = inlined_call_operand.vmem [shape: f32[64,32], index: 9, kind: input, shape index: {}]   ;;  %s4483_s10 = inlined_call_operand.vmem [shape: f32[1,32], index: 10, kind: input, shape index: {}]   ;;  %s4484_s11 = inlined_call_operand.hbm [shape: f32[16,32], index: 11, kind: output, shape index: {}]  }
   0x1   :  { %17 = vsyncpa [#allocation7], 0 }
   0x2   :  { %18 = vsyncpa [#allocation10], 0 }
   0x3   :  { %19 = vsyncpa [#allocation5], 0  ;;  %s3817_s17 = smov [#allocation6]   ;;  %s3818_s19 = smov [#allocation3]  }
   0x4   :  { %s37_s18 = sshll.u32 %s3817_s17, 4  ;;  %s25_s20 = sshll.u32 %s3818_s19, 4  ;;  %s38_s18 = int_to_ptr.vmem [resolvable:$true] %s37_s18  ;;  %s3899_s20 = int_to_ptr.vmem [resolvable:$true] %s25_s20 }
   0x5   :  { %s3699_s23 = scalar_lea.hbm %s4474_s1, 256 }
   0x6   :  { %p3700_p0 = scmp.ne.s32.totalorder %s4474_s1, %s3699_s23  ;;  %p3703_p1 = scmp.lt.u32.totalorder %s3699_s23, %s4474_s1 }
   0x8   :  { %p3705_p2 = pnand %p3703_p1, %p3700_p0 }
   0xa   :  { %3708 = shalt.err (!%p3705_p2)
}
   0xb   :  { %s3709_s28 = scalar_lea.vmem %s38_s18, 256  ;;  %p3714_p4 = scmp.lt.s32.totalorder %s38_s18, %s38_s18 }
   0xc   :  { %p3710_p3 = scmp.ne.s32.totalorder %s38_s18, %s3709_s28  ;;  %p3715_p5 = scmp.lt.s32.totalorder %s3709_s28, %s3709_s28 }
   0xe   :  { %p3716_p6 = por %p3715_p5, %p3714_p4 }
  0x10   :  { %p3717_p7 = pnand %p3716_p6, %p3710_p3 }
  0x12   :  { %3720 = shalt.err (!%p3717_p7)
}
  0x13   :  { %s3819_s29 = smov 128   ;;  %s3820_s30 = smov 8  }
  0x14   :  { %43 = dma.hbm_to_vmem [thread:$0]  %s4474_s1, 256, %s38_s18, [#allocation7], %s3819_s29, %s3819_s29, %s3820_s30  }
  0x15   :  { %s3721_s16 = scalar_lea.hbm %s4473_s0, 256 }
  0x16   :  { %p3722_p8 = scmp.ne.s32.totalorder %s4473_s0, %s3721_s16  ;;  %p3725_p9 = scmp.lt.u32.totalorder %s3721_s16, %s4473_s0 }
  0x18   :  { %p3727_p10 = pnand %p3725_p9, %p3722_p8 }
  0x1a   :  { %3730 = shalt.err (!%p3727_p10)
}
  0x1b   :  { %s3731_s23 = scalar_lea.vmem %s3899_s20, 256  ;;  %p3736_p12 = scmp.lt.s32.totalorder %s3899_s20, %s3899_s20 }
  0x1c   :  { %p3732_p11 = scmp.ne.s32.totalorder %s3899_s20, %s3731_s23  ;;  %p3737_p13 = scmp.lt.s32.totalorder %s3731_s23, %s3731_s23 }
  0x1e   :  { %p3738_p0 = por %p3737_p13, %p3736_p12 }
  0x20   :  { %p3739_p1 = pnand %p3738_p0, %p3732_p11 }
  0x22   :  { %3742 = shalt.err (!%p3739_p1)
}
  0x23   :  { %31 = dma.hbm_to_vmem [thread:$0]  %s4473_s0, 256, %s3899_s20, [#allocation4], %s3819_s29, %s3819_s29, %s3820_s30  }
  0x24   :  { %s3821_s24 = smov [#allocation8]   ;;  %s3822_s26 = smov [#allocation9]  }
  0x25   :  { %s49_s25 = sshll.u32 %s3821_s24, 4  ;;  %s72_s27 = sshll.u32 %s3822_s26, 4  ;;  %s50_s25 = int_to_ptr.vmem [resolvable:$true] %s49_s25  ;;  %s73_s27 = int_to_ptr.vmem [resolvable:$true] %s72_s27 }
  0x26   :  { %s3743_s13 = scalar_lea.hbm %s4475_s2, 256 }
  0x27   :  { %p3744_p2 = scmp.ne.s32.totalorder %s4475_s2, %s3743_s13  ;;  %p3747_p3 = scmp.lt.u32.totalorder %s3743_s13, %s4475_s2 }
  0x29   :  { %p3749_p4 = pnand %p3747_p3, %p3744_p2 }
  0x2b   :  { %3752 = shalt.err (!%p3749_p4)
}
  0x2c   :  { %s3753_s0 = scalar_lea.vmem %s50_s25, 256  ;;  %p3758_p6 = scmp.lt.s32.totalorder %s50_s25, %s50_s25 }
  0x2d   :  { %p3754_p5 = scmp.ne.s32.totalorder %s50_s25, %s3753_s0  ;;  %p3759_p7 = scmp.lt.s32.totalorder %s3753_s0, %s3753_s0 }
  0x2f   :  { %p3760_p8 = por %p3759_p7, %p3758_p6 }
  0x31   :  { %p3761_p9 = pnand %p3760_p8, %p3754_p5 }
  0x33   :  { %3764 = shalt.err (!%p3761_p9)
}
  0x34   :  { %55 = dma.hbm_to_vmem [thread:$0]  %s4475_s2, 256, %s50_s25, [#allocation7], %s3819_s29, %s3819_s29, %s3820_s30  }
  0x35   :  { %s3765_s23 = scalar_lea.hbm %s4481_s8, 16 }
  0x36   :  { %p3766_p10 = scmp.ne.s32.totalorder %s4481_s8, %s3765_s23  ;;  %p3769_p11 = scmp.lt.u32.totalorder %s3765_s23, %s4481_s8 }
  0x38   :  { %p3771_p12 = pnand %p3769_p11, %p3766_p10 }
  0x3a   :  { %3774 = shalt.err (!%p3771_p12)
}
  0x3b   :  { %s3775_s28 = scalar_lea.vmem %s73_s27, 16  ;;  %s3779_s12 = scalar_lea.vmem %s73_s27, 32 }
  0x3c   :  { %p3776_p13 = scmp.ne.s32.totalorder %s73_s27, %s3775_s28  ;;  %p3780_p0 = scmp.lt.s32.totalorder %s73_s27, %s73_s27 }
  0x3d   :  { %p3781_p1 = scmp.lt.s32.totalorder %s3779_s12, %s3775_s28 }
  0x3f   :  { %p3782_p2 = por %p3781_p1, %p3780_p0 }
  0x41   :  { %p3783_p3 = pnand %p3782_p2, %p3776_p13 }
  0x43   :  { %3786 = shalt.err (!%p3783_p3)
}
  0x44   :  { %75 = dma.hbm_to_vmem [thread:$0]  %s4481_s8, 16, %s73_s27, [#allocation10]  }
  0x45   :  { %3809 = dma.done.wait [#allocation4], 256  }
  0x46   :  { %3810 = vsyncadd [#allocation4], 4294967040 }
  0x47   :  { %3811 = dma.done.wait [#allocation7], 512  }
  0x48   :  { %3812 = vsyncadd [#allocation7], 4294966784 }
  0x49   :  { %3813 = dma.done.wait [#allocation10], 16  }
  0x4a   :  { %3814 = vsyncadd [#allocation10], 4294967280  ;;  %vm105_vm0 = vcmask 261120   ;;  %v94_v0 = vld [vmem:[%s4476_s3] sm:$0xff]  ;;  %v95_v1 = vld [vmem:[%s4476_s3 + $0x8] sm:$0xff]  ;;  %v3823_v24 = vmov 0.0  }
  0x4b   :  { %v96_v2 = vld [vmem:[%s4476_s3 + $0x10] sm:$0xff]  ;;  %v3573_v3 = vpack.c.bf16 %v95_v1, %v94_v0  ;;  %v97_v4 = vld [vmem:[%s4476_s3 + $0x18] sm:$0xff]  ;;  %v189_v7 = vld [vmem:[%s4478_s5] sm:$0xff]  ;;  %vm3824_vm1 = vmmov 0   ;;  %vm377_vm2 = vcmask 64512   ;;  %s3825_s17 = smov 112  }
  0x4c   :  { %v92_v5 = vld [vmem:[#allocation3] sm:$0xff]  ;;  %v3577_v6 = vpack.c.bf16 %v97_v4, %v96_v2  ;;  %v190_v8 = vld [vmem:[%s4478_s5 + $0x8] sm:$0xff]  ;;  %v283_v9 = vld [vmem:[%s4480_s7] sm:$0xff]  ;;  %s3826_s0 = smov 120   ;;  %s3829_s8 = smov 88   ;;  %vm709_vm3 = vcmask 130112  }
  0x4d   :  { %3369 = vmatprep.mubr.msk.f32.mxu1 %vm105_vm0, %v92_v5  ;;  %3574 = vmatprep.subr.bf16.mxu1 %v3573_v3  ;;  %v284_v10 = vld [vmem:[%s4480_s7 + $0x8] sm:$0xff]  ;;  %v285_v11 = vld [vmem:[%s4480_s7 + $0x10] sm:$0xff]  ;;  %v3581_v12 = vpack.c.bf16 %v190_v8, %v189_v7  ;;  %v286_v14 = vld [vmem:[%s4480_s7 + $0x18] sm:$0xff]  ;;  %s3830_s27 = smov 80   ;;  %s3831_s20 = smov 72   ;;  %vm880_vm4 = vcmask 195712  }
  0x4e   :  { %3576 = vmatpush3.bf16.msra.mxu1 %v3573_v3  ;;  %v3589_v13 = vpack.c.bf16 %v284_v10, %v283_v9  ;;  %v281_v15 = vld [vmem:[#allocation8] sm:$0xff]  ;;  %v192_v17 = vld [vmem:[%s4478_s5 + $0x18] sm:$0xff]  ;;  %v3593_v18 = vpack.c.bf16 %v286_v14, %v285_v11  ;;  %v187_v21 = vld [vmem:[#allocation6] sm:$0xff]  ;;  %s3832_s19 = smov 16   ;;  %s3833_s21 = smov 24   ;;  %vm1051_vm5 = vcmask 261312  }
  0x4f   :  { %3578 = vmatprep.subr.bf16.mxu1 %v3577_v6  ;;  %v191_v16 = vld [vmem:[%s4478_s5 + $0x10] sm:$0xff]  ;;  %3391 = vmatprep.mubr.msk.f32.mxu0 %vm105_vm0, %v281_v15  ;;  %v93_v19 = vld [vmem:[#allocation3 + $0x8] sm:$0xff]  ;;  %v188_v23 = vld [vmem:[#allocation6 + $0x8] sm:$0xff]  ;;  %s3834_s22 = smov 32   ;;  %s3835_s23 = smov 40   ;;  %vm1222_vm6 = vcmask 326912  }
  0x50   :  { %3590 = vmatprep.subr.bf16.mxu0 %v3589_v13  ;;  %v3585_v20 = vpack.c.bf16 %v192_v17, %v191_v16  ;;  %v282_v22 = vld [vmem:[#allocation8 + $0x8] sm:$0xff]  ;;  %v3209_v27 = vld [vmem:[%s4477_s4] ss:$0 sm:$0xff]  ;;  %s3827_s4 = smov 104   ;;  %s3836_s1 = smov 48   ;;  %vm1393_vm7 = vcmask 392512  }
  0x51   :  { %3592 = vmatpush3.bf16.msra.mxu0 %v3589_v13  ;;  %v3212_v28 = vld [vmem:[%s4479_s6] ss:$0 sm:$0xff]  ;;  %s3828_s6 = smov 96   ;;  %s3837_s18 = smov 56   ;;  %vm1564_vm8 = vcmask 458112   ;;  %vm1735_vm9 = vcmask 523712  }
  0x52   :  { %3580 = vmatpush3.bf16.msra.mxu1 %v3577_v6  ;;  %3594 = vmatprep.subr.bf16.mxu0 %v3593_v18  ;;  %v3215_v38 = vld [vmem:[#allocation9] ss:$0 sm:$0xff]  ;;  %vm3106_vm10 = vcmask 523264  }
  0x53   :  { %3582 = vmatprep.subr.bf16.mxu1 %v3581_v12 }
  0x55   :  { %3370 = vmatmul.mubr.msk.f32.vlgmr.msra.gmra.mrb[0].mxu1 %vm105_vm0, %v93_v19  ;;  %3596 = vmatpush3.bf16.msra.mxu0 %v3593_v18 }
  0x56   :  { %3584 = vmatpush3.bf16.msra.mxu1 %v3581_v12  ;;  %3380 = vmatprep.mubr.msk.f32.mxu1 %vm105_vm0, %v187_v21 }
  0x57   :  { %3586 = vmatprep.subr.bf16.mxu1 %v3585_v20  ;;  %3404 = vmatprep.subr.mxu0 %v3823_v24 }
  0x58   :  { %3392 = vmatmul.mubr.msk.f32.vlgmr.msra.gmra.mrb[0].mxu0 %vm105_vm0, %v282_v22 }
  0x59   :  { %3406 = vmatprep.mubr.msk.f32.mxu0 %vm3824_vm1, %v3823_v24 }
  0x5a   :  { %3588 = vmatpush3.bf16.msra.mxu1 %v3585_v20 }
  0x5b   :  { %3394 = vmatprep.subr.mxu1 %v3823_v24 }
  0x5d   :  { %3381 = vmatmul.mubr.msk.f32.vlgmr.msra.gmra.mrb[2].mxu1 %vm105_vm0, %v188_v23 }
  0x5e   :  { %3396 = vmatprep.mubr.msk.f32.mxu1 %vm3824_vm1, %v3823_v24 }
 0x128   :  { %v3371_v25 = vpop.f32.mrb[0].mxu1 }
 0x129   :  { %v178_v26 = vpop.f32.mrb[1].mxu1  ;;  %v184_v34 = vadd.f32 %v3371_v25, %v3209_v27 }
 0x12a   :  { %v179_v31 = vadd.f32 %v3209_v27, %v178_v26 }
 0x12b   :  { %v4036_v35 = vmul.f32 0.35355338, %v184_v34  ;;  %v3393_v37 = vpop.f32.mrb[0].mxu0 }
 0x12c   :  { %v375_v33 = vmul.f32 0.35355338, %v179_v31  ;;  %v4064_v39 = vadd.f32 %v3393_v37, %v3215_v38  ;;  %v366_v40 = vpop.f32.mrb[1].mxu0 }
 0x12d   :  { %v4066_v41 = vadd.f32 %v3215_v38, %v366_v40 }
 0x130   :  { %v3382_v29 = vpop.f32.mrb[2].mxu1 }
 0x131   :  { %v272_v30 = vpop.f32.mrb[3].mxu1  ;;  %v4038_v36 = vadd.f32 %v3382_v29, %v3212_v28 }
 0x132   :  { %v273_v32 = vadd.f32 %v3212_v28, %v272_v30 }
 0x134   :  { %713 = vrot.lane.b32.xlu1 %v273_v32, %s3825_s17  ;;  %541 = vrot.lane.b32.xlu0 %v273_v32, %s3826_s0 }
 0x135   :  { %3395 = vmatpush3.xpose.msk.msra.mxu1 %vm377_vm2, %v273_v32 }
 0x136   :  { %3399 = vmatprep.subr.mxu1 %v3823_v24 }
 0x138   :  { %3397 = vmatmul.mubr.msk.f32.vlgmr.msra.gmra.mrb[4].mxu1 %vm377_vm2, %v375_v33  ;;  %711 = vrot.lane.b32.xlu1 %v375_v33, %s3825_s17 }
 0x139   :  { %539 = vrot.lane.b32.xlu0 %v375_v33, %s3826_s0  ;;  %3401 = vmatprep.mubr.msk.f32.mxu1 %vm3824_vm1, %v3823_v24 }
 0x13a   :  { %3400 = vmatpush3.msra.mxu1 %v4066_v41 }
 0x13b   :  { %3409 = vmatprep.subr.mxu1 %v3823_v24 }
 0x13c   :  { %882 = vrot.lane.b32.xlu1 %v375_v33, %s3827_s4 }
 0x13d   :  { %884 = vrot.lane.b32.xlu0 %v273_v32, %s3827_s4 }
 0x140   :  { %1053 = vrot.lane.b32.xlu1 %v375_v33, %s3828_s6 }
 0x141   :  { %1055 = vrot.lane.b32.xlu0 %v273_v32, %s3828_s6 }
 0x144   :  { %1224 = vrot.lane.b32.xlu1 %v375_v33, %s3829_s8 }
 0x145   :  { %1226 = vrot.lane.b32.xlu0 %v273_v32, %s3829_s8 }
 0x148   :  { %1395 = vrot.lane.b32.xlu1 %v375_v33, %s3830_s27 }
 0x149   :  { %1397 = vrot.lane.b32.xlu0 %v273_v32, %s3830_s27 }
 0x14c   :  { %1566 = vrot.lane.b32.xlu1 %v375_v33, %s3831_s20 }
 0x14d   :  { %1568 = vrot.lane.b32.xlu0 %v273_v32, %s3831_s20 }
 0x150   :  { %1898 = vrot.lane.b32.xlu1 %v4036_v35, %s3826_s0 }
 0x151   :  { %1900 = vrot.lane.b32.xlu0 %v4038_v36, %s3826_s0 }
 0x154   :  { %2069 = vrot.lane.b32.xlu1 %v4036_v35, %s3825_s17 }
 0x155   :  { %2071 = vrot.lane.b32.xlu0 %v4038_v36, %s3825_s17 }
 0x158   :  { %2239 = vrot.lane.b32.xlu1 %v4036_v35, %s3827_s4 }
 0x159   :  { %2241 = vrot.lane.b32.xlu0 %v4038_v36, %s3827_s4 }
 0x15c   :  { %2409 = vrot.lane.b32.xlu1 %v4036_v35, %s3828_s6 }
 0x15d   :  { %2411 = vrot.lane.b32.xlu0 %v4038_v36, %s3828_s6 }
 0x160   :  { %2579 = vrot.lane.b32.xlu1 %v4036_v35, %s3829_s8 }
 0x161   :  { %2581 = vrot.lane.b32.xlu0 %v4038_v36, %s3829_s8 }
 0x164   :  { %2749 = vrot.lane.b32.xlu1 %v4036_v35, %s3830_s27 }
 0x165   :  { %2751 = vrot.lane.b32.xlu0 %v4038_v36, %s3830_s27 }
 0x168   :  { %2919 = vrot.lane.b32.xlu1 %v4036_v35, %s3831_s20 }
 0x169   :  { %2921 = vrot.lane.b32.xlu0 %v4038_v36, %s3831_s20 }
 0x16c   :  { %629 = vrot.lane.b32.xlu1 %v4066_v41, %s3826_s0 }
 0x16d   :  { %800 = vrot.lane.b32.xlu0 %v4066_v41, %s3825_s17 }
 0x171   :  { %971 = vrot.lane.b32.xlu0 %v4066_v41, %s3827_s4 }
 0x1a6   :  { %v714_v42 = vpop.permute.xlu1 %713  ;;  %v542_v43 = vpop.permute.xlu0 %541 }
 0x1a7   :  { %3405 = vmatpush3.xpose.msk.msra.mxu0 %vm377_vm2, %v542_v43 }
 0x1a8   :  { %3414 = vmatprep.subr.mxu0 %v3823_v24 }
 0x1aa   :  { %v712_v44 = vpop.permute.xlu1 %711 }
 0x1ab   :  { %v540_v45 = vpop.permute.xlu0 %539 }
 0x1ac   :  { %3407 = vmatmul.mubr.msk.f32.vlgmr.msra.gmra.mrb[2].mxu0 %vm377_vm2, %v540_v45 }
 0x1ad   :  { %3415 = vmatpush3.xpose.msk.msra.mxu0 %vm377_vm2, %v714_v42  ;;  %3416 = vmatprep.mubr.msk.f32.mxu0 %vm3824_vm1, %v3823_v24 }
 0x1ae   :  { %v883_v46 = vpop.permute.xlu1 %882  ;;  %3424 = vmatprep.subr.mxu0 %v3823_v24 }
 0x1af   :  { %v885_v47 = vpop.permute.xlu0 %884 }
 0x1b0   :  { %3417 = vmatmul.mubr.msk.f32.vlgmr.msra.gmra.mrb[4].mxu0 %vm377_vm2, %v712_v44 }
 0x1b1   :  { %3425 = vmatpush3.xpose.msk.msra.mxu0 %vm377_vm2, %v885_v47  ;;  %3426 = vmatprep.mubr.msk.f32.mxu0 %vm3824_vm1, %v3823_v24 }
 0x1b2   :  { %v1054_v48 = vpop.permute.xlu1 %1053  ;;  %3434 = vmatprep.subr.mxu0 %v3823_v24 }
 0x1b3   :  { %v1056_v49 = vpop.permute.xlu0 %1055 }
 0x1b4   :  { %3427 = vmatmul.mubr.msk.f32.vlgmr.msra.gmra.mrb[6].mxu0 %vm377_vm2, %v883_v46 }
 0x1b5   :  { %3435 = vmatpush3.xpose.msk.msra.mxu0 %vm377_vm2, %v1056_v49  ;;  %3436 = vmatprep.mubr.msk.f32.mxu0 %vm3824_vm1, %v3823_v24 }
 0x1b6   :  { %v1225_v50 = vpop.permute.xlu1 %1224  ;;  %3444 = vmatprep.subr.mxu0 %v3823_v24 }
 0x1b7   :  { %v1227_v51 = vpop.permute.xlu0 %1226 }
 0x1b8   :  { %3437 = vmatmul.mubr.msk.f32.vlgmr.msra.gmra.mrb[8].mxu0 %vm377_vm2, %v1054_v48 }
 0x1b9   :  { %3445 = vmatpush3.xpose.msk.msra.mxu0 %vm377_vm2, %v1227_v51  ;;  %3446 = vmatprep.mubr.msk.f32.mxu0 %vm3824_vm1, %v3823_v24 }
 0x1ba   :  { %v1396_v52 = vpop.permute.xlu1 %1395  ;;  %3454 = vmatprep.subr.mxu0 %v3823_v24 }
 0x1bb   :  { %v1398_v53 = vpop.permute.xlu0 %1397 }
 0x1bc   :  { %3447 = vmatmul.mubr.msk.f32.vlgmr.msra.gmra.mrb[10].mxu0 %vm377_vm2, %v1225_v50 }
 0x1bd   :  { %3455 = vmatpush3.xpose.msk.msra.mxu0 %vm377_vm2, %v1398_v53  ;;  %3456 = vmatprep.mubr.msk.f32.mxu0 %vm3824_vm1, %v3823_v24 }
 0x1be   :  { %v1567_v54 = vpop.permute.xlu1 %1566  ;;  %3464 = vmatprep.subr.mxu0 %v3823_v24 }
 0x1bf   :  { %v1569_v55 = vpop.permute.xlu0 %1568 }
 0x1c0   :  { %3457 = vmatmul.mubr.msk.f32.vlgmr.msra.gmra.mrb[12].mxu0 %vm377_vm2, %v1396_v52 }
 0x1c1   :  { %3465 = vmatpush3.xpose.msk.msra.mxu0 %vm377_vm2, %v1569_v55  ;;  %3466 = vmatprep.mubr.msk.f32.mxu0 %vm3824_vm1, %v3823_v24 }
 0x1c2   :  { %v1899_v56 = vpop.permute.xlu1 %1898  ;;  %3474 = vmatprep.subr.mxu0 %v3823_v24 }
 0x1c3   :  { %v1901_v57 = vpop.permute.xlu0 %1900 }
 0x1c4   :  { %3467 = vmatmul.mubr.msk.f32.vlgmr.msra.gmra.mrb[14].mxu0 %vm377_vm2, %v1567_v54 }
 0x1c5   :  { %3475 = vmatpush3.xpose.msk.msra.mxu0 %vm377_vm2, %v4038_v36  ;;  %3476 = vmatprep.mubr.msk.f32.mxu0 %vm3824_vm1, %v3823_v24 }
 0x1c6   :  { %v2070_v58 = vpop.permute.xlu1 %2069  ;;  %3484 = vmatprep.subr.mxu0 %v3823_v24 }
 0x1c7   :  { %v2072_v59 = vpop.permute.xlu0 %2071 }
 0x1c8   :  { %3477 = vmatmul.mubr.msk.f32.vlgmr.msra.gmra.mrb[16].mxu0 %vm377_vm2, %v4036_v35 }
 0x1c9   :  { %3485 = vmatpush3.xpose.msk.msra.mxu0 %vm377_vm2, %v1901_v57  ;;  %3486 = vmatprep.mubr.msk.f32.mxu0 %vm3824_vm1, %v3823_v24 }
 0x1ca   :  { %3494 = vmatprep.subr.mxu0 %v3823_v24  ;;  %v2240_v60 = vpop.permute.xlu1 %2239 }
 0x1cb   :  { %v2242_v61 = vpop.permute.xlu0 %2241 }
 0x1cc   :  { %3487 = vmatmul.mubr.msk.f32.vlgmr.msra.gmra.mrb[18].mxu0 %vm377_vm2, %v1899_v56 }
 0x1cd   :  { %3495 = vmatpush3.xpose.msk.msra.mxu0 %vm377_vm2, %v2072_v59  ;;  %3496 = vmatprep.mubr.msk.f32.mxu0 %vm3824_vm1, %v3823_v24 }
 0x1ce   :  { %3504 = vmatprep.subr.mxu0 %v3823_v24  ;;  %v2410_v63 = vpop.permute.xlu1 %2409 }
 0x1cf   :  { %v2412_v62 = vpop.permute.xlu0 %2411 }
 0x1d0   :  { %3497 = vmatmul.mubr.msk.f32.vlgmr.msra.gmra.mrb[20].mxu0 %vm377_vm2, %v2070_v58 }
 0x1d1   :  { %3505 = vmatpush3.xpose.msk.msra.mxu0 %vm377_vm2, %v2242_v61  ;;  %3506 = vmatprep.mubr.msk.f32.mxu0 %vm3824_vm1, %v3823_v24 }
 0x1d2   :  { %3514 = vmatprep.subr.mxu0 %v3823_v24  ;;  %v2580_v1 = vpop.permute.xlu1 %2579 }
 0x1d3   :  { %v2582_v0 = vpop.permute.xlu0 %2581 }
 0x1d4   :  { %3507 = vmatmul.mubr.msk.f32.vlgmr.msra.gmra.mrb[22].mxu0 %vm377_vm2, %v2240_v60 }
 0x1d5   :  { %3515 = vmatpush3.xpose.msk.msra.mxu0 %vm377_vm2, %v2412_v62  ;;  %3516 = vmatprep.mubr.msk.f32.mxu0 %vm3824_vm1, %v3823_v24 }
 0x1d6   :  { %3524 = vmatprep.subr.mxu0 %v3823_v24  ;;  %v2750_v3 = vpop.permute.xlu1 %2749 }
 0x1d7   :  { %v2752_v2 = vpop.permute.xlu0 %2751 }
 0x1d8   :  { %3517 = vmatmul.mubr.msk.f32.vlgmr.msra.gmra.mrb[24].mxu0 %vm377_vm2, %v2410_v63 }
 0x1d9   :  { %3525 = vmatpush3.xpose.msk.msra.mxu0 %vm377_vm2, %v2582_v0  ;;  %3526 = vmatprep.mubr.msk.f32.mxu0 %vm3824_vm1, %v3823_v24 }
 0x1da   :  { %3534 = vmatprep.subr.mxu0 %v3823_v24  ;;  %v2920_v5 = vpop.permute.xlu1 %2919 }
 0x1db   :  { %v2922_v4 = vpop.permute.xlu0 %2921 }
 0x1dc   :  { %3527 = vmatmul.mubr.msk.f32.vlgmr.msra.gmra.mrb[26].mxu0 %vm377_vm2, %v2580_v1 }
 0x1dd   :  { %3535 = vmatpush3.xpose.msk.msra.mxu0 %vm377_vm2, %v2752_v2  ;;  %3536 = vmatprep.mubr.msk.f32.mxu0 %vm3824_vm1, %v3823_v24 }
 0x1de   :  { %3544 = vmatprep.subr.mxu0 %v3823_v24  ;;  %v630_v0 = vpop.permute.xlu1 %629 }
 0x1df   :  { %v4171_v21 = vpop.permute.xlu0 %800 }
 0x1e0   :  { %3537 = vmatmul.mubr.msk.f32.vlgmr.msra.gmra.mrb[28].mxu0 %vm377_vm2, %v2750_v3 }
 0x1e1   :  { %3545 = vmatpush3.xpose.msk.msra.mxu0 %vm377_vm2, %v2922_v4  ;;  %3546 = vmatprep.mubr.msk.f32.mxu0 %vm3824_vm1, %v3823_v24 }
 0x1e3   :  { %v4181_v29 = vpop.permute.xlu0 %971 }
 0x1e4   :  { %3547 = vmatmul.mubr.msk.f32.vlgmr.msra.gmra.mrb[30].mxu0 %vm377_vm2, %v2920_v5 }
 0x20b   :  { %v450_v6 = vpop.f32.mrb[4].mxu1 }
 0x20c   :  { %v3398_v7 = vpop.f32.mrb[5].mxu1  ;;  %v454_v8 = vsel %vm377_vm2, %v450_v6, -inf }
 0x20d   :  { %455 = vmax.xlane.f32.xlu0 %v454_v8 }
 0x27f   :  { %v4155_v9 = vpop.f32.mrb[2].mxu0 }
 0x280   :  { %v3408_v10 = vpop.f32.mrb[3].mxu0  ;;  %v617_v11 = vsel %vm377_vm2, %v4155_v9, -inf }
 0x281   :  { %618 = vmax.xlane.f32.xlu1 %v617_v11 }
 0x283   :  { %v4159_v12 = vpop.f32.mrb[4].mxu0 }
 0x284   :  { %v3418_v13 = vpop.f32.mrb[5].mxu0  ;;  %v789_v14 = vsel %vm377_vm2, %v4159_v12, -inf }
 0x285   :  { %790 = vmax.xlane.f32.xlu0 %v789_v14 }
 0x287   :  { %v4163_v15 = vpop.f32.mrb[6].mxu0 }
 0x288   :  { %v3428_v16 = vpop.f32.mrb[7].mxu0  ;;  %v960_v17 = vsel %vm377_vm2, %v4163_v15, -inf }
 0x289   :  { %961 = vmax.xlane.f32.xlu0 %v960_v17 }
 0x28b   :  { %v4167_v18 = vpop.f32.mrb[8].mxu0 }
 0x28c   :  { %v3438_v19 = vpop.f32.mrb[9].mxu0  ;;  %v1131_v20 = vsel %vm377_vm2, %v4167_v18, -inf }
 0x28d   :  { %1132 = vmax.xlane.f32.xlu1 %v1131_v20 }
 0x28f   :  { %v4173_v22 = vpop.f32.mrb[10].mxu0 }
 0x290   :  { %v3448_v23 = vpop.f32.mrb[11].mxu0  ;;  %v1302_v25 = vsel %vm377_vm2, %v4173_v22, -inf }
 0x291   :  { %1303 = vmax.xlane.f32.xlu0 %v1302_v25 }
 0x293   :  { %v4177_v26 = vpop.f32.mrb[12].mxu0 }
 0x294   :  { %v3458_v27 = vpop.f32.mrb[13].mxu0  ;;  %v1473_v28 = vsel %vm377_vm2, %v4177_v26, -inf }
 0x295   :  { %1474 = vmax.xlane.f32.xlu1 %v1473_v28 }
 0x297   :  { %v4183_v30 = vpop.f32.mrb[14].mxu0 }
 0x298   :  { %v3468_v31 = vpop.f32.mrb[15].mxu0  ;;  %v1644_v32 = vsel %vm377_vm2, %v4183_v30, -inf }
 0x299   :  { %1645 = vmax.xlane.f32.xlu0 %v1644_v32 }
 0x29a   :  { %v456_v33 = vpop.xlane.xlu0 %455 }
 0x29b   :  { %v457_v34 = vsub.f32 %v450_v6, %v456_v33  ;;  %v4187_v35 = vpop.f32.mrb[16].mxu0 }
 0x29c   :  { %v3478_v36 = vpop.f32.mrb[17].mxu0  ;;  %v1813_v37 = vsel %vm377_vm2, %v4187_v35, -inf }
 0x29d   :  { %v458_v38 = vmul.f32 1.442695, %v457_v34  ;;  %1814 = vmax.xlane.f32.xlu1 %v1813_v37 }
 0x29f   :  { %3635 = vpow2.f32 %v458_v38  ;;  %v4191_v40 = vpop.f32.mrb[18].mxu0 }
 0x2a0   :  { %v3488_v42 = vpop.f32.mrb[19].mxu0  ;;  %v1976_v43 = vsel %vm377_vm2, %v4191_v40, -inf }
 0x2a1   :  { %1977 = vmax.xlane.f32.xlu0 %v1976_v43 }
 0x2a3   :  { %v4195_v44 = vpop.f32.mrb[20].mxu0 }
 0x2a4   :  { %v3498_v45 = vpop.f32.mrb[21].mxu0  ;;  %v2147_v46 = vsel %vm377_vm2, %v4195_v44, -inf }
 0x2a5   :  { %2148 = vmax.xlane.f32.xlu1 %v2147_v46 }
 0x2a7   :  { %v4199_v47 = vpop.f32.mrb[22].mxu0 }
 0x2a8   :  { %v3508_v48 = vpop.f32.mrb[23].mxu0  ;;  %v2317_v49 = vsel %vm377_vm2, %v4199_v47, -inf }
 0x2a9   :  { %v4203_v50 = vpop.eup %3635  ;;  %2318 = vmax.xlane.f32.xlu0 %v2317_v49 }
 0x2aa   :  { %v460_v51 = vsel %vm377_vm2, %v4203_v50, 0.0 }
 0x2ab   :  { %v4207_v52 = vpop.f32.mrb[24].mxu0  ;;  %461 = vadd.xlane.f32.xlu1 %v460_v51 }
 0x2ac   :  { %v3518_v53 = vpop.f32.mrb[25].mxu0  ;;  %v2487_v54 = vsel %vm377_vm2, %v4207_v52, -inf }
 0x2af   :  { %v4211_v55 = vpop.f32.mrb[26].mxu0  ;;  %2488 = vmax.xlane.f32.xlu1 %v2487_v54 }
 0x2b0   :  { %v3528_v56 = vpop.f32.mrb[27].mxu0  ;;  %v2657_v57 = vsel %vm377_vm2, %v4211_v55, -inf }
 0x2b1   :  { %2658 = vmax.xlane.f32.xlu0 %v2657_v57 }
 0x2b3   :  { %v4215_v58 = vpop.f32.mrb[28].mxu0 }
 0x2b4   :  { %v3538_v59 = vpop.f32.mrb[29].mxu0  ;;  %v2827_v60 = vsel %vm377_vm2, %v4215_v58, -inf }
 0x2b5   :  { %2828 = vmax.xlane.f32.xlu1 %v2827_v60 }
 0x2b7   :  { %v4219_v61 = vpop.f32.mrb[30].mxu0 }
 0x2b8   :  { %v3548_v62 = vpop.f32.mrb[31].mxu0  ;;  %v2997_v63 = vsel %vm377_vm2, %v4219_v61, -inf }
 0x2c6   :  { %1142 = vrot.lane.b32.xlu1 %v4066_v41, %s3828_s6 }
 0x2c7   :  { %1313 = vrot.lane.b32.xlu0 %v4066_v41, %s3829_s8 }
 0x2cb   :  { %1484 = vrot.lane.b32.xlu0 %v4066_v41, %s3830_s27 }
 0x2ea   :  { %2998 = vmax.xlane.f32.xlu0 %v2997_v63 }
 0x30e   :  { %v619_v1 = vpop.xlane.xlu1 %618 }
 0x30f   :  { %v620_v2 = vsub.f32 %v4155_v9, %v619_v1 }
 0x311   :  { %v621_v3 = vmul.f32 1.442695, %v620_v2 }
 0x312   :  { %v791_v4 = vpop.xlane.xlu0 %790 }
 0x313   :  { %3637 = vpow2.f32 %v621_v3  ;;  %v792_v5 = vsub.f32 %v4159_v12, %v791_v4 }
 0x315   :  { %v793_v6 = vmul.f32 1.442695, %v792_v5 }
 0x316   :  { %v962_v7 = vpop.xlane.xlu0 %961 }
 0x317   :  { %3639 = vpow2.f32 %v793_v6  ;;  %v963_v8 = vsub.f32 %v4163_v15, %v962_v7 }
 0x319   :  { %v964_v10 = vmul.f32 1.442695, %v963_v8 }
 0x31a   :  { %v1133_v11 = vpop.xlane.xlu1 %1132 }
 0x31b   :  { %3641 = vpow2.f32 %v964_v10  ;;  %v1134_v13 = vsub.f32 %v4167_v18, %v1133_v11 }
 0x31d   :  { %v4233_v14 = vpop.eup %3637  ;;  %v1135_v16 = vmul.f32 1.442695, %v1134_v13 }
 0x31e   :  { %v1304_v17 = vpop.xlane.xlu0 %1303  ;;  %v623_v9 = vsel %vm377_vm2, %v4233_v14, 0.0 }
 0x31f   :  { %3643 = vpow2.f32 %v1135_v16  ;;  %v1305_v12 = vsub.f32 %v4173_v22, %v1304_v17  ;;  %624 = vadd.xlane.f32.xlu0 %v623_v9 }
 0x321   :  { %v4238_v19 = vpop.eup %3639  ;;  %v1306_v20 = vmul.f32 1.442695, %v1305_v12 }
 0x322   :  { %v1475_v15 = vpop.xlane.xlu1 %1474  ;;  %v795_v23 = vsel %vm377_vm2, %v4238_v19, 0.0 }
 0x323   :  { %3645 = vpow2.f32 %v1306_v20  ;;  %v1476_v18 = vsub.f32 %v4177_v26, %v1475_v15  ;;  %796 = vadd.xlane.f32.xlu1 %v795_v23 }
 0x325   :  { %v4243_v25 = vpop.eup %3641  ;;  %v1477_v27 = vmul.f32 1.442695, %v1476_v18 }
 0x326   :  { %v966_v28 = vsel %vm377_vm2, %v4243_v25, 0.0  ;;  %v1646_v45 = vpop.xlane.xlu0 %1645 }
 0x327   :  { %3647 = vpow2.f32 %v1477_v27  ;;  %967 = vadd.xlane.f32.xlu0 %v966_v28  ;;  %v1647_v53 = vsub.f32 %v4183_v30, %v1646_v45 }
 0x329   :  { %v4247_v22 = vpop.eup %3643  ;;  %v1648_v57 = vmul.f32 1.442695, %v1647_v53 }
 0x32a   :  { %v1137_v31 = vsel %vm377_vm2, %v4247_v22, 0.0  ;;  %v1815_v33 = vpop.xlane.xlu1 %1814 }
 0x32b   :  { %1138 = vadd.xlane.f32.xlu1 %v1137_v31  ;;  %v1816_v59 = vsub.f32 %v4187_v35, %v1815_v33 }
 0x32d   :  { %v4251_v32 = vpop.eup %3645  ;;  %v1817_v62 = vmul.f32 1.442695, %v1816_v59 }
 0x32e   :  { %v1308_v26 = vsel %vm377_vm2, %v4251_v32, 0.0  ;;  %v1978_v46 = vpop.xlane.xlu0 %1977 }
 0x32f   :  { %1309 = vadd.xlane.f32.xlu0 %v1308_v26 }
 0x331   :  { %v4255_v34 = vpop.eup %3647 }
 0x332   :  { %v1479_v36 = vsel %vm377_vm2, %v4255_v34, 0.0  ;;  %v2149_v37 = vpop.xlane.xlu1 %2148 }
 0x333   :  { %1480 = vadd.xlane.f32.xlu1 %v1479_v36 }
 0x336   :  { %v2319_v63 = vpop.xlane.xlu0 %2318 }
 0x337   :  { %v2320_v30 = vsub.f32 %v4199_v47, %v2319_v63 }
 0x338   :  { %v462_v38 = vpop.xlane.xlu1 %461 }
 0x339   :  { %3649 = vrcp.f32 %v462_v38  ;;  %v2321_v35 = vmul.f32 1.442695, %v2320_v30 }
 0x33c   :  { %v2489_v48 = vpop.xlane.xlu1 %2488 }
 0x33e   :  { %v2659_v1 = vpop.xlane.xlu0 %2658 }
 0x33f   :  { %v2660_v3 = vsub.f32 %v4211_v55, %v2659_v1 }
 0x341   :  { %v2661_v47 = vmul.f32 1.442695, %v2660_v3 }
 0x342   :  { %v2829_v51 = vpop.xlane.xlu1 %2828  ;;  %v1314_v12 = vpop.permute.xlu0 %1313 }
 0x343   :  { %v3650_v42 = vpop.eup %3649  ;;  %v2830_v56 = vsub.f32 %v4215_v58, %v2829_v51 }
 0x344   :  { %v464_v43 = vmul.f32 %v3650_v42, %v4203_v50  ;;  %1655 = vrot.lane.b32.xlu1 %v4066_v41, %s3831_s20  ;;  %v1979_v41 = vsub.f32 %v4191_v40, %v1978_v46  ;;  %v2490_v50 = vsub.f32 %v4207_v52, %v2489_v48  ;;  %v2150_v40 = vsub.f32 %v4195_v44, %v2149_v37 }
 0x345   :  { %1988 = vrot.lane.b32.xlu0 %v4064_v39, %s3826_s0  ;;  %v2831_v60 = vmul.f32 1.442695, %v2830_v56 }
 0x346   :  { %3402 = vmatmul.mubr.msk.f32.vlgmr.msra.gmra.mrb[6].mxu1 %vm377_vm2, %v464_v43  ;;  %v1980_v49 = vmul.f32 1.442695, %v1979_v41  ;;  %v2491_v54 = vmul.f32 1.442695, %v2490_v50  ;;  %v2151_v52 = vmul.f32 1.442695, %v2150_v40  ;;  %v1485_v20 = vpop.permute.xlu0 %1484  ;;  %v1143_v27 = vpop.permute.xlu1 %1142 }
 0x347   :  { %3410 = vmatpush3.msra.mxu1 %v630_v0  ;;  %3411 = vmatprep.mubr.msk.f32.mxu1 %vm3824_vm1, %v3823_v24 }
 0x348   :  { %3419 = vmatprep.subr.mxu1 %v3823_v24  ;;  %3651 = vpow2.f32 %v1980_v49 }
 0x349   :  { %2158 = vrot.lane.b32.xlu0 %v4064_v39, %s3825_s17  ;;  %3653 = vpow2.f32 %v2491_v54 }
 0x34a   :  { %3655 = vpow2.f32 %v1648_v57 }
 0x34b   :  { %3657 = vpow2.f32 %v2831_v60 }
 0x34c   :  { %3659 = vpow2.f32 %v1817_v62 }
 0x34d   :  { %2328 = vrot.lane.b32.xlu0 %v4064_v39, %s3827_s4  ;;  %3661 = vpow2.f32 %v2151_v52 }
 0x34e   :  { %3663 = vpow2.f32 %v2321_v35 }
 0x34f   :  { %3665 = vpow2.f32 %v2661_v47 }
 0x351   :  { %2498 = vrot.lane.b32.xlu0 %v4064_v39, %s3828_s6 }
 0x352   :  { %v4280_v0 = vpop.eup %3651 }
 0x353   :  { %v1982_v58 = vsel %vm377_vm2, %v4280_v0, 0.0  ;;  %v4285_v2 = vpop.eup %3653 }
 0x354   :  { %v4288_v44 = vpop.eup %3655  ;;  %v2493_v4 = vsel %vm377_vm2, %v4285_v2, 0.0 }
 0x355   :  { %v4292_v5 = vpop.eup %3657  ;;  %v1650_v6 = vsel %vm377_vm2, %v4288_v44, 0.0 }
 0x356   :  { %v2833_v7 = vsel %vm377_vm2, %v4292_v5, 0.0  ;;  %v4298_v8 = vpop.eup %3659 }
 0x357   :  { %v1819_v55 = vsel %vm377_vm2, %v4298_v8, 0.0  ;;  %v4302_v10 = vpop.eup %3661 }
 0x358   :  { %v2153_v11 = vsel %vm377_vm2, %v4302_v10, 0.0  ;;  %v4306_v13 = vpop.eup %3663 }
 0x359   :  { %v2323_v16 = vsel %vm377_vm2, %v4306_v13, 0.0  ;;  %v4310_v17 = vpop.eup %3665 }
 0x35a   :  { %v2663_v9 = vsel %vm377_vm2, %v4310_v17, 0.0 }
 0x368   :  { %1983 = vadd.xlane.f32.xlu1 %v1982_v58 }
 0x36c   :  { %2494 = vadd.xlane.f32.xlu1 %v2493_v4 }
 0x370   :  { %1651 = vadd.xlane.f32.xlu0 %v1650_v6  ;;  %2834 = vadd.xlane.f32.xlu1 %v2833_v7 }
 0x374   :  { %1820 = vadd.xlane.f32.xlu0 %v1819_v55 }
 0x377   :  { %v2999_v15 = vpop.xlane.xlu0 %2998 }
 0x378   :  { %2154 = vadd.xlane.f32.xlu0 %v2153_v11  ;;  %v3000_v23 = vsub.f32 %v4219_v61, %v2999_v15 }
 0x37a   :  { %v3001_v18 = vmul.f32 1.442695, %v3000_v23 }
 0x37c   :  { %2324 = vadd.xlane.f32.xlu0 %v2323_v16  ;;  %3667 = vpow2.f32 %v3001_v18 }
 0x380   :  { %2664 = vadd.xlane.f32.xlu0 %v2663_v9 }
 0x381   :  { %2668 = vrot.lane.b32.xlu1 %v4064_v39, %s3829_s8  ;;  %s3838_s8 = smov [#allocation11]  }
 0x386   :  { %v4319_v26 = vpop.eup %3667 }
 0x387   :  { %v3003_v36 = vsel %vm377_vm2, %v4319_v26, 0.0 }
 0x396   :  { %2838 = vrot.lane.b32.xlu0 %v4064_v39, %s3830_s27  ;;  %s3195_s27 = sshll.u32 %s3838_s8, 4  ;;  %s3196_s27 = int_to_ptr.vmem [resolvable:$true] %s3195_s27 }
 0x397   :  { %p3792_p5 = scmp.lt.s32.totalorder %s3196_s27, %s3196_s27 }
 0x3ac   :  { %v625_v28 = vpop.xlane.xlu0 %624 }
 0x3ad   :  { %3669 = vrcp.f32 %v625_v28 }
 0x3b0   :  { %v797_v31 = vpop.xlane.xlu1 %796 }
 0x3b1   :  { %3671 = vrcp.f32 %v797_v31 }
 0x3b4   :  { %v968_v33 = vpop.xlane.xlu0 %967 }
 0x3b5   :  { %3673 = vrcp.f32 %v968_v33  ;;  %3004 = vadd.xlane.f32.xlu0 %v3003_v36 }
 0x3b7   :  { %v3670_v37 = vpop.eup %3669 }
 0x3b8   :  { %v627_v38 = vmul.f32 %v3670_v37, %v4233_v14  ;;  %v1139_v42 = vpop.xlane.xlu1 %1138 }
 0x3b9   :  { %3675 = vrcp.f32 %v1139_v42 }
 0x3ba   :  { %3412 = vmatmul.mubr.msk.f32.vlgmr.msra.gmra.mrb[8].mxu1 %vm377_vm2, %v627_v38 }
 0x3bb   :  { %v3672_v61 = vpop.eup %3671  ;;  %3420 = vmatpush3.msra.mxu1 %v4171_v21  ;;  %3421 = vmatprep.mubr.msk.f32.mxu1 %vm3824_vm1, %v3823_v24 }
 0x3bc   :  { %v799_v43 = vmul.f32 %v3672_v61, %v4238_v19  ;;  %v1310_v45 = vpop.xlane.xlu0 %1309  ;;  %3429 = vmatprep.subr.mxu1 %v3823_v24 }
 0x3bd   :  { %3677 = vrcp.f32 %v1310_v45 }
 0x3be   :  { %3422 = vmatmul.mubr.msk.f32.vlgmr.msra.gmra.mrb[10].mxu1 %vm377_vm2, %v799_v43 }
 0x3bf   :  { %v3674_v46 = vpop.eup %3673  ;;  %3430 = vmatpush3.msra.mxu1 %v4181_v29  ;;  %3431 = vmatprep.mubr.msk.f32.mxu1 %vm3824_vm1, %v3823_v24 }
 0x3c0   :  { %v970_v14 = vmul.f32 %v3674_v46, %v4243_v25  ;;  %v1481_v21 = vpop.xlane.xlu1 %1480  ;;  %3439 = vmatprep.subr.mxu1 %v3823_v24 }
 0x3c1   :  { %3679 = vrcp.f32 %v1481_v21 }
 0x3c2   :  { %3432 = vmatmul.mubr.msk.f32.vlgmr.msra.gmra.mrb[12].mxu1 %vm377_vm2, %v970_v14 }
 0x3c3   :  { %v3676_v19 = vpop.eup %3675  ;;  %3440 = vmatpush3.msra.mxu1 %v1143_v27  ;;  %3441 = vmatprep.mubr.msk.f32.mxu1 %vm3824_vm1, %v3823_v24 }
 0x3c4   :  { %v1141_v41 = vmul.f32 %v3676_v19, %v4247_v22  ;;  %3449 = vmatprep.subr.mxu1 %v3823_v24  ;;  %v1656_v49 = vpop.permute.xlu1 %1655  ;;  %v3091_v19 = vld [vmem:[%s4482_s9] sm:$0xff] }
 0x3c6   :  { %3442 = vmatmul.mubr.msk.f32.vlgmr.msra.gmra.mrb[14].mxu1 %vm377_vm2, %v1141_v41  ;;  %v3092_v41 = vld [vmem:[%s4482_s9 + $0x8] sm:$0xff] }
 0x3c7   :  { %v3678_v29 = vpop.eup %3677  ;;  %3450 = vmatpush3.msra.mxu1 %v1314_v12  ;;  %3451 = vmatprep.mubr.msk.f32.mxu1 %vm3824_vm1, %v3823_v24 }
 0x3c8   :  { %v1312_v25 = vmul.f32 %v3678_v29, %v4251_v32  ;;  %3459 = vmatprep.subr.mxu1 %v3823_v24  ;;  %v1989_v32 = vpop.permute.xlu0 %1988  ;;  %v3093_v29 = vld [vmem:[%s4482_s9 + $0x10] sm:$0xff] }
 0x3ca   :  { %3452 = vmatmul.mubr.msk.f32.vlgmr.msra.gmra.mrb[16].mxu1 %vm377_vm2, %v1312_v25 }
 0x3cb   :  { %v3680_v48 = vpop.eup %3679  ;;  %3460 = vmatpush3.msra.mxu1 %v1485_v20  ;;  %3008 = vrot.lane.b32.xlu0 %v4064_v39, %s3831_s20  ;;  %s3787_s20 = scalar_lea.vmem %s3196_s27, 256 }
 0x3cc   :  { %v1483_v22 = vmul.f32 %v3680_v48, %v4255_v34  ;;  %3461 = vmatprep.mubr.msk.f32.mxu1 %vm3824_vm1, %v3823_v24  ;;  %3469 = vmatprep.subr.mxu1 %v3823_v24  ;;  %v2159_v50 = vpop.permute.xlu0 %2158  ;;  %v3597_v48 = vpack.c.bf16 %v3092_v41, %v3091_v19  ;;  %p3788_p4 = scmp.ne.s32.totalorder %s3196_s27, %s3787_s20  ;;  %p3793_p6 = scmp.lt.s32.totalorder %s3787_s20, %s3787_s20 }
 0x3ce   :  { %3462 = vmatmul.mubr.msk.f32.vlgmr.msra.gmra.mrb[18].mxu1 %vm377_vm2, %v1483_v22  ;;  %v3094_v22 = vld [vmem:[%s4482_s9 + $0x18] sm:$0xff]  ;;  %3598 = vmatprep.subr.bf16.mxu0 %v3597_v48  ;;  %p3794_p7 = por %p3793_p6, %p3792_p5 }
 0x3cf   :  { %3470 = vmatpush3.msra.mxu1 %v1656_v49  ;;  %3471 = vmatprep.mubr.msk.f32.mxu1 %vm3824_vm1, %v3823_v24  ;;  %v3601_v49 = vpack.c.bf16 %v3094_v22, %v3093_v29 }
 0x3d0   :  { %3479 = vmatprep.subr.mxu1 %v3823_v24  ;;  %v2329_v51 = vpop.permute.xlu0 %2328  ;;  %3600 = vmatpush3.bf16.msra.mxu0 %v3597_v48  ;;  %p3795_p8 = pnand %p3794_p7, %p3788_p4 }
 0x3d1   :  { %3602 = vmatprep.subr.bf16.mxu0 %v3601_v49 }
 0x3d4   :  { %v2499_v53 = vpop.permute.xlu0 %2498  ;;  %3604 = vmatpush3.bf16.msra.mxu0 %v3601_v49 }
 0x3f5   :  { %v1984_v56 = vpop.xlane.xlu1 %1983 }
 0x3f9   :  { %v2495_v52 = vpop.xlane.xlu1 %2494 }
 0x3fd   :  { %v1652_v54 = vpop.xlane.xlu0 %1651  ;;  %v2835_v35 = vpop.xlane.xlu1 %2834 }
 0x3fe   :  { %3681 = vrcp.f32 %v1652_v54 }
 0x401   :  { %v1821_v34 = vpop.xlane.xlu0 %1820  ;;  %v2669_v55 = vpop.permute.xlu1 %2668 }
 0x402   :  { %3683 = vrcp.f32 %v1821_v34 }
 0x403   :  { %3685 = vrcp.f32 %v1984_v56 }
 0x405   :  { %v2155_v57 = vpop.xlane.xlu0 %2154 }
 0x406   :  { %3687 = vrcp.f32 %v2155_v57 }
 0x408   :  { %v3682_v59 = vpop.eup %3681 }
 0x409   :  { %v1654_v60 = vmul.f32 %v3682_v59, %v4288_v44  ;;  %v2325_v62 = vpop.xlane.xlu0 %2324 }
 0x40a   :  { %3689 = vrcp.f32 %v2325_v62 }
 0x40b   :  { %3472 = vmatmul.mubr.msk.f32.vlgmr.msra.gmra.mrb[20].mxu1 %vm377_vm2, %v1654_v60  ;;  %3691 = vrcp.f32 %v2495_v52  ;;  %v3096_v52 = vld [vmem:[%s4482_s9 + $0x28] sm:$0xff] }
 0x40c   :  { %v3684_v40 = vpop.eup %3683  ;;  %3480 = vmatpush3.msra.mxu1 %v4064_v39  ;;  %3481 = vmatprep.mubr.msk.f32.mxu1 %vm3824_vm1, %v3823_v24 }
 0x40d   :  { %v1823_v63 = vmul.f32 %v3684_v40, %v4298_v8  ;;  %3489 = vmatprep.subr.mxu1 %v3823_v24  ;;  %v3686_v30 = vpop.eup %3685  ;;  %v2665_v58 = vpop.xlane.xlu0 %2664 }
 0x40e   :  { %v1986_v1 = vmul.f32 %v3686_v30, %v4280_v0  ;;  %3693 = vrcp.f32 %v2665_v58  ;;  %v3098_v58 = vld [vmem:[%s4482_s9 + $0x38] sm:$0xff] }
 0x40f   :  { %3482 = vmatmul.mubr.msk.f32.vlgmr.msra.gmra.mrb[22].mxu1 %vm377_vm2, %v1823_v63  ;;  %3695 = vrcp.f32 %v2835_v35  ;;  %v3095_v63 = vld [vmem:[%s4482_s9 + $0x20] sm:$0xff] }
 0x410   :  { %3490 = vmatpush3.msra.mxu1 %v1989_v32  ;;  %3491 = vmatprep.mubr.msk.f32.mxu1 %vm3824_vm1, %v3823_v24  ;;  %v3688_v39 = vpop.eup %3687  ;;  %v3605_v30 = vpack.c.bf16 %v3096_v52, %v3095_v63 }
 0x411   :  { %3499 = vmatprep.subr.mxu1 %v3823_v24  ;;  %v2157_v3 = vmul.f32 %v3688_v39, %v4302_v10 }
 0x412   :  { %3606 = vmatprep.subr.bf16.mxu0 %v3605_v30 }
 0x413   :  { %3492 = vmatmul.mubr.msk.f32.vlgmr.msra.gmra.mrb[24].mxu1 %vm377_vm2, %v1986_v1  ;;  %v3097_v1 = vld [vmem:[%s4482_s9 + $0x30] sm:$0xff]  ;;  %3608 = vmatpush3.bf16.msra.mxu0 %v3605_v30 }
 0x414   :  { %3500 = vmatpush3.msra.mxu1 %v2159_v50  ;;  %3501 = vmatprep.mubr.msk.f32.mxu1 %vm3824_vm1, %v3823_v24  ;;  %v3690_v44 = vpop.eup %3689  ;;  %v3609_v39 = vpack.c.bf16 %v3098_v58, %v3097_v1 }
 0x415   :  { %3509 = vmatprep.subr.mxu1 %v3823_v24  ;;  %v2327_v4 = vmul.f32 %v3690_v44, %v4306_v13  ;;  %v3692_v6 = vpop.eup %3691  ;;  %v2839_v13 = vpop.permute.xlu0 %2838 }
 0x416   :  { %v2497_v7 = vmul.f32 %v3692_v6, %v4285_v2  ;;  %3610 = vmatprep.subr.bf16.mxu0 %v3609_v39 }
 0x417   :  { %3502 = vmatmul.mubr.msk.f32.vlgmr.msra.gmra.mrb[26].mxu1 %vm377_vm2, %v2157_v3  ;;  %3612 = vmatpush3.bf16.msra.mxu0 %v3609_v39 }
 0x418   :  { %3510 = vmatpush3.msra.mxu1 %v2329_v51  ;;  %3511 = vmatprep.mubr.msk.f32.mxu1 %vm3824_vm1, %v3823_v24  ;;  %v3694_v8 = vpop.eup %3693 }
 0x419   :  { %v534_v0 = vpop.f32.mrb[6].mxu1  ;;  %3519 = vmatprep.subr.mxu1 %v3823_v24  ;;  %v2667_v10 = vmul.f32 %v3694_v8, %v4310_v17  ;;  %v3696_v11 = vpop.eup %3695 }
 0x41a   :  { %538 = vst.msk [vmem:[#allocation2] sm:$0xff] %vm377_vm2, %v534_v0  ;;  %v3403_v47 = vpop.f32.mrb[7].mxu1  ;;  %v2837_v2 = vmul.f32 %v3696_v11, %v4292_v5 }
 0x41b   :  { %3512 = vmatmul.mubr.msk.f32.vlgmr.msra.gmra.mrb[28].mxu1 %vm377_vm2, %v2327_v4 }
 0x41c   :  { %3520 = vmatpush3.msra.mxu1 %v2499_v53  ;;  %3521 = vmatprep.mubr.msk.f32.mxu1 %vm3824_vm1, %v3823_v24 }
 0x41d   :  { %3529 = vmatprep.subr.mxu1 %v3823_v24 }
 0x41f   :  { %3522 = vmatmul.mubr.msk.f32.vlgmr.msra.gmra.mrb[30].mxu1 %vm377_vm2, %v2497_v7 }
 0x420   :  { %3530 = vmatpush3.msra.mxu1 %v2669_v55  ;;  %3531 = vmatprep.mubr.msk.f32.mxu1 %vm3824_vm1, %v3823_v24 }
 0x421   :  { %3539 = vmatprep.subr.mxu1 %v3823_v24 }
 0x423   :  { %3532 = vmatmul.mubr.msk.f32.vlgmr.msra.gmra.mrb[32].mxu1 %vm377_vm2, %v2667_v10 }
 0x424   :  { %3540 = vmatpush3.msra.mxu1 %v2839_v13  ;;  %3541 = vmatprep.mubr.msk.f32.mxu1 %vm3824_vm1, %v3823_v24  ;;  %v3266_v13 = vld [vmem:[%s4483_s10] ss:$0 sm:$0xff] }
 0x425   :  { %3549 = vmatprep.subr.mxu1 %v3823_v24 }
 0x427   :  { %3542 = vmatmul.mubr.msk.f32.vlgmr.msra.gmra.mrb[34].mxu1 %vm377_vm2, %v2837_v2 }
 0x428   :  { %3551 = vmatprep.mubr.msk.f32.mxu1 %vm3824_vm1, %v3823_v24 }
 0x442   :  { %v3005_v16 = vpop.xlane.xlu0 %3004 }
 0x443   :  { %3697 = vrcp.f32 %v3005_v16 }
 0x446   :  { %v3009_v17 = vpop.permute.xlu0 %3008 }
 0x447   :  { %3550 = vmatpush3.msra.mxu1 %v3009_v17 }
 0x44d   :  { %v3698_v9 = vpop.eup %3697 }
 0x44e   :  { %v3007_v12 = vmul.f32 %v3698_v9, %v4319_v26 }
 0x450   :  { %3552 = vmatmul.mubr.msk.f32.vlgmr.msra.gmra.mrb[36].mxu1 %vm377_vm2, %v3007_v12 }
 0x48d   :  { %v701_v20 = vpop.f32.mrb[8].mxu1 }
 0x48e   :  { %706 = vrot.lane.b32.xlu0 %v701_v20, %s3820_s30  ;;  %v3413_v5 = vpop.f32.mrb[9].mxu1 }
 0x491   :  { %v872_v15 = vpop.f32.mrb[10].mxu1 }
 0x492   :  { %877 = vrot.lane.b32.xlu0 %v872_v15, %s3832_s19  ;;  %v3423_v23 = vpop.f32.mrb[11].mxu1 }
 0x495   :  { %v1043_v18 = vpop.f32.mrb[12].mxu1 }
 0x496   :  { %1048 = vrot.lane.b32.xlu0 %v1043_v18, %s3833_s21  ;;  %v3433_v24 = vpop.f32.mrb[13].mxu1 }
 0x499   :  { %v1214_v27 = vpop.f32.mrb[14].mxu1 }
 0x49a   :  { %1219 = vrot.lane.b32.xlu0 %v1214_v27, %s3834_s22  ;;  %v3443_v28 = vpop.f32.mrb[15].mxu1 }
 0x49d   :  { %v1385_v31 = vpop.f32.mrb[16].mxu1 }
 0x49e   :  { %1390 = vrot.lane.b32.xlu0 %v1385_v31, %s3835_s23  ;;  %v3453_v26 = vpop.f32.mrb[17].mxu1 }
 0x4a1   :  { %v1556_v33 = vpop.f32.mrb[18].mxu1 }
 0x4a2   :  { %1561 = vrot.lane.b32.xlu0 %v1556_v33, %s3836_s1  ;;  %v3463_v36 = vpop.f32.mrb[19].mxu1 }
 0x4de   :  { %v1727_v37 = vpop.f32.mrb[20].mxu1 }
 0x4df   :  { %1732 = vrot.lane.b32.xlu0 %v1727_v37, %s3837_s18  ;;  %v3473_v38 = vpop.f32.mrb[21].mxu1 }
 0x4e2   :  { %v1893_v42 = vpop.f32.mrb[22].mxu1 }
 0x4e3   :  { %1897 = vst.msk [vmem:[#allocation2 + $0x8] sm:$0xff] %vm377_vm2, %v1893_v42  ;;  %v3483_v61 = vpop.f32.mrb[23].mxu1 }
 0x4e6   :  { %v2060_v43 = vpop.f32.mrb[24].mxu1 }
 0x4e7   :  { %2065 = vrot.lane.b32.xlu1 %v2060_v43, %s3820_s30  ;;  %v3493_v45 = vpop.f32.mrb[25].mxu1 }
 0x4ea   :  { %v2230_v46 = vpop.f32.mrb[26].mxu1 }
 0x4eb   :  { %2235 = vrot.lane.b32.xlu1 %v2230_v46, %s3832_s19  ;;  %v3503_v14 = vpop.f32.mrb[27].mxu1 }
 0x4ee   :  { %v2400_v21 = vpop.f32.mrb[28].mxu1 }
 0x4ef   :  { %2405 = vrot.lane.b32.xlu1 %v2400_v21, %s3833_s21  ;;  %v3513_v25 = vpop.f32.mrb[29].mxu1 }
 0x4f2   :  { %v2570_v32 = vpop.f32.mrb[30].mxu1 }
 0x4f3   :  { %2575 = vrot.lane.b32.xlu1 %v2570_v32, %s3834_s22  ;;  %v3523_v50 = vpop.f32.mrb[31].mxu1 }
 0x4f6   :  { %v2740_v51 = vpop.f32.mrb[32].mxu1 }
 0x4f7   :  { %2745 = vrot.lane.b32.xlu1 %v2740_v51, %s3835_s23  ;;  %v3533_v53 = vpop.f32.mrb[33].mxu1 }
 0x4fa   :  { %v2910_v54 = vpop.f32.mrb[34].mxu1 }
 0x4fb   :  { %2915 = vrot.lane.b32.xlu1 %v2910_v54, %s3836_s1  ;;  %v3543_v34 = vpop.f32.mrb[35].mxu1 }
 0x500   :  { %v707_v56 = vpop.permute.xlu0 %706 }
 0x501   :  { %710 = vst.msk [vmem:[#allocation2] sm:$0xff] %vm709_vm3, %v707_v56 }
 0x504   :  { %v878_v57 = vpop.permute.xlu0 %877 }
 0x505   :  { %881 = vst.msk [vmem:[#allocation2] sm:$0xff] %vm880_vm4, %v878_v57 }
 0x508   :  { %v1049_v59 = vpop.permute.xlu0 %1048 }
 0x509   :  { %1052 = vst.msk [vmem:[#allocation2] sm:$0xff] %vm1051_vm5, %v1049_v59 }
 0x50c   :  { %v1220_v60 = vpop.permute.xlu0 %1219 }
 0x50d   :  { %1223 = vst.msk [vmem:[#allocation2] sm:$0xff] %vm1222_vm6, %v1220_v60 }
 0x510   :  { %v1391_v62 = vpop.permute.xlu0 %1390 }
 0x511   :  { %1394 = vst.msk [vmem:[#allocation2] sm:$0xff] %vm1393_vm7, %v1391_v62 }
 0x514   :  { %v1562_v40 = vpop.permute.xlu0 %1561 }
 0x515   :  { %1565 = vst.msk [vmem:[#allocation2] sm:$0xff] %vm1564_vm8, %v1562_v40 }
 0x523   :  { %v3080_v35 = vpop.f32.mrb[36].mxu1 }
 0x524   :  { %3085 = vrot.lane.b32.xlu0 %v3080_v35, %s3837_s18  ;;  %v3553_v3 = vpop.f32.mrb[37].mxu1 }
 0x551   :  { %v1733_v44 = vpop.permute.xlu0 %1732 }
 0x552   :  { %1736 = vst.msk [vmem:[#allocation2] sm:$0xff] %vm1735_vm9, %v1733_v44 }
 0x559   :  { %v2066_v0 = vpop.permute.xlu1 %2065  ;;  %v3089_v4 = vld [vmem:[#allocation2] sm:$0xff] }
 0x55a   :  { %2068 = vst.msk [vmem:[#allocation2 + $0x8] sm:$0xff] %vm709_vm3, %v2066_v0  ;;  %3570 = vmatprep.mubr.msk.f32.mxu0 %vm3106_vm10, %v3089_v4 }
 0x55d   :  { %v2236_v47 = vpop.permute.xlu1 %2235 }
 0x55e   :  { %2238 = vst.msk [vmem:[#allocation2 + $0x8] sm:$0xff] %vm880_vm4, %v2236_v47 }
 0x561   :  { %v2406_v6 = vpop.permute.xlu1 %2405 }
 0x562   :  { %2408 = vst.msk [vmem:[#allocation2 + $0x8] sm:$0xff] %vm1051_vm5, %v2406_v6 }
 0x565   :  { %v2576_v7 = vpop.permute.xlu1 %2575 }
 0x566   :  { %2578 = vst.msk [vmem:[#allocation2 + $0x8] sm:$0xff] %vm1222_vm6, %v2576_v7 }
 0x569   :  { %v2746_v8 = vpop.permute.xlu1 %2745 }
 0x56a   :  { %2748 = vst.msk [vmem:[#allocation2 + $0x8] sm:$0xff] %vm1393_vm7, %v2746_v8 }
 0x56d   :  { %v2916_v55 = vpop.permute.xlu1 %2915 }
 0x56e   :  { %2918 = vst.msk [vmem:[#allocation2 + $0x8] sm:$0xff] %vm1564_vm8, %v2916_v55 }
 0x596   :  { %v3086_v10 = vpop.permute.xlu0 %3085 }
 0x597   :  { %3088 = vst.msk [vmem:[#allocation2 + $0x8] sm:$0xff] %vm1735_vm9, %v3086_v10 }
 0x59e   :  { %v3090_v11 = vld [vmem:[#allocation2 + $0x8] sm:$0xff] }
 0x59f   :  { %3571 = vmatmul.mubr.msk.f32.vlgmr.msra.gmra.mrb[32].mxu0 %vm3106_vm10, %v3090_v11 }
 0x672   :  { %v3572_v2 = vpop.f32.mrb[32].mxu0 }
 0x673   :  { %v3185_v16 = vadd.f32 %v3572_v2, %v3266_v13  ;;  %v3179_v17 = vpop.f32.mrb[33].mxu0 }
 0x674   :  { %v3180_v9 = vadd.f32 %v3266_v13, %v3179_v17 }
 0x675   :  { %3189 = vst.msk [vmem:[#allocation11 + $0x8] sm:$0xff] %vm105_vm0, %v3185_v16 }
 0x676   :  { %3188 = vst.msk [vmem:[#allocation11] sm:$0xff] %vm105_vm0, %v3180_v9 }
 0x677   :  { %3798 = shalt.err (!%p3795_p8)
}
 0x678   :  { %s3799_s21 = scalar_lea.hbm %s4484_s11, 256 }
 0x679   :  { %p3800_p9 = scmp.ne.s32.totalorder %s4484_s11, %s3799_s21  ;;  %p3803_p10 = scmp.lt.u32.totalorder %s3799_s21, %s4484_s11 }
 0x67b   :  { %p3805_p11 = pnand %p3803_p10, %p3800_p9 }
 0x67d   :  { %3808 = shalt.err (!%p3805_p11)
}
 0x67e   :  { %3201 = dma.vmem_to_hbm [thread:$0]  %s3196_s27, 256, %s4484_s11, [#allocation5], %s3819_s29, %s3819_s29, %s3820_s30  }
 0x67f   :  { %3815 = dma.done.wait [#allocation5], 256  }
 0x680   :  { %3816 = vsyncadd [#allocation5], 4294967040 }
 0x681   :  { %3205 = vsyncpa [#allocation4], 1 }
 0x682   :  { %3206 = vsyncpa [#allocation7], 1 }
 0x683   :  { %3207 = vsyncpa [#allocation10], 1 }
 0x684   :  { %3208 = vsyncpa [#allocation5], 1 }

</bundles_post_ra>
